<compile_context>
chip_gen: v6e
topology: v6e:2x2x1
jax: 0.10.0
libtpu: 0.0.40
codegen_flags: <defaults>
</compile_context>

<pallas_src>
import math
import jax
import jax.numpy as jnp
from jax import lax
from jax.experimental import pallas as pl
from jax.experimental.pallas import tpu as pltpu

# ---- synthetic PraxisConfig ----
CAUSAL = True
DIFFERENTIAL = True          # this script implements the differential path
CONTEXT_LEN = 64
HIDDEN = 32
NUM_HEADS = 4
HEAD_DIM = HIDDEN // NUM_HEADS
LAMBDA_INIT = 0.8
GN_EPS = 1e-5
NEG = -1e9
# TODO(synk): nn.Dropout is treated as identity (eval mode / p=0.0); stateful dropout not implemented.
# TODO(synk): only the differential=True path is implemented (matches the config above).


def _softmax_lastdim(s):
    m = jnp.max(s, axis=-1, keepdims=True)
    e = jnp.exp(s - m)
    # EUP reciprocal (approx) keeps the softmax divide off the VALU slot.
    return e * pl.reciprocal(jnp.sum(e, axis=-1, keepdims=True), approx=True)


def _make_kernel(Bblk, S, use_positions):
    H, D, E = NUM_HEADS, HEAD_DIM, HIDDEN
    # ALiBi slopes are a pure function of h -> bake as Python constants.
    slopes = [2.0 ** (-8.0 * (h + 1) / H) for h in range(H)]
    inv_n = 1.0 / (S * D)
    dn_qkT = (((1,), (1,)), ((), ()))   # contract last dims: q @ k^T (no explicit transpose)

    def kernel(lam_ref, *refs):
        if use_positions:
            (x_ref, pos_c_ref, pos_r_ref, mask_ref,
             wq_ref, wk_ref, wv_ref, wo_ref, gn_g_ref, gn_b_ref,
             o_ref, nh_buf) = refs
        else:
            (x_ref, mask_ref,
             wq_ref, wk_ref, wv_ref, wo_ref, gn_g_ref, gn_b_ref,
             o_ref, nh_buf) = refs

        lam = lam_ref[0]                 # differential-attention scalar
        gn_g = gn_g_ref[...]             # (1, H*D), pre-scaled by (1 - lambda_init)
        gn_b = gn_b_ref[...]
        mask = mask_ref[...]             # (Bblk, 1, S)

        # Fused full-width projections over all Bblk*S rows (3 MXU pushes per grid step).
        # (Bblk, S, E) -> (Bblk*S, E) is a leading-dim reshape only (S % 8 == 0).
        x2d = x_ref[...].reshape(Bblk * S, E)
        q_all = jnp.dot(x2d, wq_ref[...], preferred_element_type=jnp.float32)   # 1/sqrt(D) folded into Wq
        k_all = jnp.dot(x2d, wk_ref[...], preferred_element_type=jnp.float32)
        v_all = jnp.dot(x2d, wv_ref[...], preferred_element_type=jnp.float32)

        row = lax.broadcasted_iota(jnp.int32, (S, S), 0)
        col = lax.broadcasted_iota(jnp.int32, (S, S), 1)
        if CAUSAL:
            causal_bias = jnp.where(col > row, NEG, 0.0).astype(jnp.float32)
        else:
            causal_bias = jnp.zeros((S, S), jnp.float32)

        for b in range(Bblk):
            # Per-batch additive bias (causal + key mask); ALiBi term added per head below.
            mbias = (1.0 - mask[b]) * NEG                      # (1, S)
            base_bias = causal_bias + mbias                    # (S, S)

            if use_positions:
                pd = pos_c_ref[b] - pos_r_ref[b]               # (S,1)-(1,S) -> (S,S) pos_q - pos_k
            else:
                pd = (row - col).astype(jnp.float32)           # positions == arange(S)

            qb = q_all[b * S:(b + 1) * S]
            kb = k_all[b * S:(b + 1) * S]
            vb = v_all[b * S:(b + 1) * S]

            # Pass 1: attention per head + single-pass GroupNorm stats (sum, sum-of-squares).
            ah_list, stat_list = [], []
            for h in range(H):
                q1 = qb[:, h * 2 * D:h * 2 * D + D]
                q2 = qb[:, h * 2 * D + D:(h + 1) * 2 * D]
                k1 = kb[:, h * 2 * D:h * 2 * D + D]
                k2 = kb[:, h * 2 * D + D:(h + 1) * 2 * D]
                vh = vb[:, h * D:(h + 1) * D]

                # One combined bias per head (ALiBi + causal + key mask); stays f32.
                bias_h = base_bias - slopes[h] * pd

                s1 = lax.dot_general(q1, k1, dn_qkT,
                                     preferred_element_type=jnp.float32) + bias_h
                s2 = lax.dot_general(q2, k2, dn_qkT,
                                     preferred_element_type=jnp.float32) + bias_h
                w1 = _softmax_lastdim(s1)
                w2 = _softmax_lastdim(s2)
                dw = w1 - lam * w2                              # differential attention weights

                ah = jnp.dot(dw, vh, preferred_element_type=jnp.float32)   # (S, D)
                ah_list.append(ah)
                stat_list.append((jnp.sum(ah, keepdims=True),
                                  jnp.sum(ah * ah, keepdims=True)))

            # Pass 2: normalize + affine, writing each head's slab into the VMEM scratch so
            # the output projection below is a single wide matmul (no per-head Wo pushes).
            for h in range(H):
                ah = ah_list[h]
                s_sum, s_sq = stat_list[h]
                mean = s_sum * inv_n
                var = s_sq * inv_n - mean * mean
                nh = (ah - mean) * lax.rsqrt(var + GN_EPS)
                nh = nh * gn_g[:, h * D:(h + 1) * D] + gn_b[:, h * D:(h + 1) * D]
                nh_buf[b * S:(b + 1) * S, h * D:(h + 1) * D] = nh

        # Single output projection over all rows of the batch block.
        out2d = jnp.dot(nh_buf[...], wo_ref[...], preferred_element_type=jnp.float32)
        o_ref[...] = out2d.reshape(Bblk, S, E)

    return kernel


def praxis_attention(x, attention_mask, token_indices, params, block_b=None):
    B, S, E = x.shape
    H, D = NUM_HEADS, HEAD_DIM

    if block_b is None:
        # Amortize the ~0.35us per-step pipeline overhead over several batches, but keep
        # >= 2 grid steps when possible so v7x's two TensorCores both get work.
        block_b = max(1, pl.cdiv(B, 2))
    block_b = min(block_b, B)
    num_steps = pl.cdiv(B, block_b)

    use_positions = token_indices is not None

    # Fold 1/sqrt(D) into Wq and (1 - lambda_init) into the GroupNorm affine params
    # (tiny grid-invariant tensors; one-time cost, constant-folds under jit).
    wq = params["wq"] * (1.0 / math.sqrt(D))
    gn_g = params["gn_g"] * (1.0 - LAMBDA_INIT)
    gn_b = params["gn_b"] * (1.0 - LAMBDA_INIT)

    lam = (jnp.exp(jnp.dot(params["lq1"], params["lk1"]))
           - jnp.exp(jnp.dot(params["lq2"], params["lk2"])) + LAMBDA_INIT)
    lam = lam.reshape(1).astype(jnp.float32)

    mask = attention_mask[:, None, :]                       # (B, 1, S)

    inputs = [x]
    in_specs = [pl.BlockSpec((block_b, S, E), lambda b, *_: (b, 0, 0))]
    if use_positions:
        positions_buf = jnp.arange(CONTEXT_LEN, dtype=jnp.float32)
        positions = positions_buf[token_indices]            # (B, S)
        inputs += [positions[:, :, None], positions[:, None, :]]
        in_specs += [pl.BlockSpec((block_b, S, 1), lambda b, *_: (b, 0, 0)),
                     pl.BlockSpec((block_b, 1, S), lambda b, *_: (b, 0, 0))]
    inputs.append(mask)
    in_specs.append(pl.BlockSpec((block_b, 1, S), lambda b, *_: (b, 0, 0)))

    weights = [wq, params["wk"], params["wv"], params["wo"], gn_g, gn_b]
    inputs += weights
    in_specs += [pl.BlockSpec(w.shape, lambda b, *_: (0, 0)) for w in weights]

    grid_spec = pltpu.PrefetchScalarGridSpec(
        num_scalar_prefetch=1,                               # lambda scalar in SMEM
        grid=(num_steps,),
        in_specs=in_specs,
        out_specs=pl.BlockSpec((block_b, S, E), lambda b, *_: (b, 0, 0)),
        scratch_shapes=[pltpu.VMEM((block_b * S, H * D), jnp.float32)],
    )

    return pl.pallas_call(
        _make_kernel(block_b, S, use_positions),
        grid_spec=grid_spec,
        out_shape=jax.ShapeDtypeStruct((B, S, E), jnp.float32),
        compiler_params=pltpu.CompilerParams(dimension_semantics=("parallel",)),
    )(lam, *inputs)


def praxis_attention_reference(x, attention_mask, token_indices, params):
    """Pure-JAX mirror of the PyTorch forward (differential path) for verification."""
    B, S, E = x.shape
    H, D = NUM_HEADS, HEAD_DIM
    q = (x @ params["wq"]).reshape(B, S, H, 2 * D).transpose(0, 2, 1, 3)
    k = (x @ params["wk"]).reshape(B, S, H, 2 * D).transpose(0, 2, 1, 3)
    v = (x @ params["wv"]).reshape(B, S, H, D).transpose(0, 2, 1, 3)
    recip = 1.0 / math.sqrt(D)
    s1 = jnp.einsum("bhqd,bhkd->bhqk", q[..., :D], k[..., :D]) * recip
    s2 = jnp.einsum("bhqd,bhkd->bhqk", q[..., D:], k[..., D:]) * recip

    positions_buf = jnp.arange(CONTEXT_LEN, dtype=jnp.float32)
    if token_indices is not None:
        positions = positions_buf[token_indices]
    else:
        positions = jnp.broadcast_to(positions_buf[:S][None, :], (B, S))
    pos_diff = positions[:, :, None] - positions[:, None, :]
    slopes = 2.0 ** (-8.0 * jnp.arange(1, H + 1, dtype=jnp.float32) / H)
    biases = slopes[None, :, None, None] * pos_diff[:, None]
    s1, s2 = s1 - biases, s2 - biases
    causal = jnp.triu(jnp.full((S, S), NEG, jnp.float32), 1)[None, None]
    s1, s2 = s1 + causal, s2 + causal
    mb = (1.0 - attention_mask)[:, None, None, :] * NEG
    s1, s2 = s1 + mb, s2 + mb
    w1 = jax.nn.softmax(s1, axis=-1)
    w2 = jax.nn.softmax(s2, axis=-1)
    lam = (jnp.exp(jnp.dot(params["lq1"], params["lk1"]))
           - jnp.exp(jnp.dot(params["lq2"], params["lk2"])) + LAMBDA_INIT)
    dw = w1 - lam * w2
    att = jnp.einsum("bhqk,bhkd->bhqd", dw, v)                       # (B,H,S,D)
    att = att.transpose(0, 2, 1, 3).reshape(B, S, H * D).transpose(0, 2, 1)   # (B, C, S)
    g = att.reshape(B, H, D, S)
    mean = g.mean(axis=(2, 3), keepdims=True)
    var = ((g - mean) ** 2).mean(axis=(2, 3), keepdims=True)
    g = (g - mean) / jnp.sqrt(var + GN_EPS)
    att = (g.reshape(B, H * D, S) * params["gn_g"].reshape(1, H * D, 1)
           + params["gn_b"].reshape(1, H * D, 1))
    att = att.transpose(0, 2, 1) * (1.0 - LAMBDA_INIT)
    return att @ params["wo"]


def init_params(key):
    ks = jax.random.split(key, 8)
    E, H, D = HIDDEN, NUM_HEADS, HEAD_DIM
    scale = 1.0 / math.sqrt(E)
    params = {
        # stored transposed: (in_features, out_features)
        "wq": jax.random.uniform(ks[0], (E, H * 2 * D), jnp.float32, -scale, scale),
        "wk": jax.random.uniform(ks[1], (E, H * 2 * D), jnp.float32, -scale, scale),
        "wv": jax.random.uniform(ks[2], (E, H * D), jnp.float32, -scale, scale),
        "wo": jax.random.uniform(ks[3], (H * D, E), jnp.float32,
                                 -1.0 / math.sqrt(H * D), 1.0 / math.sqrt(H * D)),
        # differential-attention lambdas (torch.randn(head_dim))
        "lq1": jax.random.normal(ks[4], (D,), jnp.float32),
        "lq2": jax.random.normal(ks[5], (D,), jnp.float32),
        "lk1": jax.random.normal(ks[6], (D,), jnp.float32),
        "lk2": jax.random.normal(ks[7], (D,), jnp.float32),
        # GroupNorm affine params (PyTorch defaults: ones / zeros)
        "gn_g": jnp.ones((1, H * D), jnp.float32),
        "gn_b": jnp.zeros((1, H * D), jnp.float32),
    }
    return params


if __name__ == "__main__":
    key = jax.random.PRNGKey(0)
    k_param, k_x = jax.random.split(key)

    B, S, E = 2, 16, HIDDEN
    params = init_params(k_param)
    x = jax.random.normal(k_x, (B, S, E), jnp.float32)

    # attention mask: 1 = keep, 0 = masked (mask out the last 3 keys of batch 1)
    attention_mask = jnp.ones((B, S), jnp.float32)
    attention_mask = attention_mask.at[1, S - 3:].set(0.0)

    # 1) default blocking: block_b = ceil(B/2) -> 2 grid steps, no positions DMA.
    out = jax.block_until_ready(praxis_attention(x, attention_mask, None, params))
    ref = jax.block_until_ready(
        praxis_attention_reference(x, attention_mask, None, params))
    assert out.shape == (B, S, E)
    # tolerance slightly loosened for the approx EUP reciprocal in the softmax
    assert jnp.allclose(out, ref, atol=5e-3, rtol=5e-3), (
        f"max abs diff {jnp.max(jnp.abs(out - ref))}")

    # 2) whole batch in one grid step (exercises the batch-blocked projection path).
    out2 = jax.block_until_ready(
        praxis_attention(x, attention_mask, None, params, block_b=B))
    assert jnp.allclose(out2, ref, atol=5e-3, rtol=5e-3), (
        f"max abs diff {jnp.max(jnp.abs(out2 - ref))}")

    # 3) explicit token_indices (exercises the ALiBi positions path).
    token_indices = (jnp.arange(S, dtype=jnp.int32)[None, :]
                     + jnp.array([[0], [4]], jnp.int32))              # (B, S), < CONTEXT_LEN
    out3 = jax.block_until_ready(
        praxis_attention(x, attention_mask, token_indices, params))
    ref3 = jax.block_until_ready(
        praxis_attention_reference(x, attention_mask, token_indices, params))
    assert jnp.allclose(out3, ref3, atol=5e-3, rtol=5e-3), (
        f"max abs diff {jnp.max(jnp.abs(out3 - ref3))}")

    print("KERNEL_OK")
</pallas_src>

<mosaic_0001>
module attributes {stable_mosaic.version = 11 : i64} {
  func.func @kernel(%arg0: i32, %arg1: memref<1xf32, #tpu.memory_space<smem>>, %arg2: memref<1x16x32xf32, #tpu.memory_space<vmem>>, %arg3: memref<1x1x16xf32, #tpu.memory_space<vmem>>, %arg4: memref<32x64xf32, #tpu.memory_space<vmem>>, %arg5: memref<32x64xf32, #tpu.memory_space<vmem>>, %arg6: memref<32x32xf32, #tpu.memory_space<vmem>>, %arg7: memref<32x32xf32, #tpu.memory_space<vmem>>, %arg8: memref<1x32xf32, #tpu.memory_space<vmem>>, %arg9: memref<1x32xf32, #tpu.memory_space<vmem>>, %arg10: memref<1x16x32xf32, #tpu.memory_space<vmem>>, %arg11: memref<16x32xf32, #tpu.memory_space<vmem>>) attributes {dimension_semantics = [#tpu.dimension_semantics<parallel>], iteration_bounds = array<i64: 2>, scalar_prefetch = 1 : i64, scratch_operands = 1 : i64, tpu.core_type = #tpu.core_type<tc>, window_params = [{transform_indices = @transform_0, window_bounds = array<i64: 1, 16, 32>}, {transform_indices = @transform_1, window_bounds = array<i64: 1, 1, 16>}, {pipeline_mode = #tpu.pipeline_mode<synchronous>, transform_indices = @transform_2, window_bounds = array<i64: 32, 64>}, {pipeline_mode = #tpu.pipeline_mode<synchronous>, transform_indices = @transform_3, window_bounds = array<i64: 32, 64>}, {pipeline_mode = #tpu.pipeline_mode<synchronous>, transform_indices = @transform_4, window_bounds = array<i64: 32, 32>}, {pipeline_mode = #tpu.pipeline_mode<synchronous>, transform_indices = @transform_5, window_bounds = array<i64: 32, 32>}, {pipeline_mode = #tpu.pipeline_mode<synchronous>, transform_indices = @transform_6, window_bounds = array<i64: 1, 32>}, {pipeline_mode = #tpu.pipeline_mode<synchronous>, transform_indices = @transform_7, window_bounds = array<i64: 1, 32>}, {transform_indices = @transform_8, window_bounds = array<i64: 1, 16, 32>}]} {
    %c0 = arith.constant 0 : index
    %0 = memref.load %arg1[%c0] : memref<1xf32, #tpu.memory_space<smem>>
    %c0_0 = arith.constant 0 : index
    %c0_1 = arith.constant 0 : index
    %1 = vector.load %arg8[%c0_0, %c0_1] : memref<1x32xf32, #tpu.memory_space<vmem>>, vector<1x32xf32>
    %c0_2 = arith.constant 0 : index
    %c0_3 = arith.constant 0 : index
    %2 = vector.load %arg9[%c0_2, %c0_3] : memref<1x32xf32, #tpu.memory_space<vmem>>, vector<1x32xf32>
    %c0_4 = arith.constant 0 : index
    %c0_5 = arith.constant 0 : index
    %c0_6 = arith.constant 0 : index
    %3 = vector.load %arg3[%c0_4, %c0_5, %c0_6] : memref<1x1x16xf32, #tpu.memory_space<vmem>>, vector<1x1x16xf32>
    %c0_7 = arith.constant 0 : index
    %c0_8 = arith.constant 0 : index
    %c0_9 = arith.constant 0 : index
    %4 = vector.load %arg2[%c0_7, %c0_8, %c0_9] : memref<1x16x32xf32, #tpu.memory_space<vmem>>, vector<1x16x32xf32>
    %5 = vector.shape_cast %4 : vector<1x16x32xf32> to vector<16x32xf32>
    %c0_10 = arith.constant 0 : index
    %c0_11 = arith.constant 0 : index
    %6 = vector.load %arg4[%c0_10, %c0_11] : memref<32x64xf32, #tpu.memory_space<vmem>>, vector<32x64xf32>
    %cst = arith.constant dense<0.000000e+00> : vector<16x64xf32>
    %7 = tpu.matmul %5, %6, %cst {dimension_numbers = #tpu.dot_dimension_numbers<[1], [0], [0], [1], [0, 0, 1, 1], [], []>} : vector<16x32xf32>, vector<32x64xf32>, vector<16x64xf32> -> vector<16x64xf32>
    %c0_12 = arith.constant 0 : index
    %c0_13 = arith.constant 0 : index
    %8 = vector.load %arg5[%c0_12, %c0_13] : memref<32x64xf32, #tpu.memory_space<vmem>>, vector<32x64xf32>
    %cst_14 = arith.constant dense<0.000000e+00> : vector<16x64xf32>
    %9 = tpu.matmul %5, %8, %cst_14 {dimension_numbers = #tpu.dot_dimension_numbers<[1], [0], [0], [1], [0, 0, 1, 1], [], []>} : vector<16x32xf32>, vector<32x64xf32>, vector<16x64xf32> -> vector<16x64xf32>
    %c0_15 = arith.constant 0 : index
    %c0_16 = arith.constant 0 : index
    %10 = vector.load %arg6[%c0_15, %c0_16] : memref<32x32xf32, #tpu.memory_space<vmem>>, vector<32x32xf32>
    %cst_17 = arith.constant dense<0.000000e+00> : vector<16x32xf32>
    %11 = tpu.matmul %5, %10, %cst_17 {dimension_numbers = #tpu.dot_dimension_numbers<[1], [0], [0], [1], [0, 0, 1, 1], [], []>} : vector<16x32xf32>, vector<32x32xf32>, vector<16x32xf32> -> vector<16x32xf32>
    %12 = tpu.iota {dimensions = array<i32: 0>} : vector<16x16xi32>
    %13 = tpu.iota {dimensions = array<i32: 1>} : vector<16x16xi32>
    %14 = arith.cmpi sgt, %13, %12 : vector<16x16xi32>
    %cst_18 = arith.constant -1.000000e+09 : f32
    %cst_19 = arith.constant 0.000000e+00 : f32
    %15 = vector.broadcast %cst_18 : f32 to vector<16x16xf32>
    %16 = vector.broadcast %cst_19 : f32 to vector<16x16xf32>
    %17 = arith.select %14, %15, %16 : vector<16x16xi1>, vector<16x16xf32>
    %18 = vector.shape_cast %3 : vector<1x1x16xf32> to vector<1x16xf32>
    %cst_20 = arith.constant 1.000000e+00 : f32
    %19 = vector.broadcast %cst_20 : f32 to vector<1x16xf32>
    %20 = arith.subf %19, %18 : vector<1x16xf32>
    %cst_21 = arith.constant -1.000000e+09 : f32
    %21 = vector.broadcast %cst_21 : f32 to vector<1x16xf32>
    %22 = arith.mulf %20, %21 : vector<1x16xf32>
    %23 = vector.broadcast %22 : vector<1x16xf32> to vector<16x16xf32>
    %24 = arith.addf %17, %23 : vector<16x16xf32>
    %25 = arith.subi %12, %13 : vector<16x16xi32>
    %26 = arith.sitofp %25 : vector<16x16xi32> to vector<16x16xf32>
    %27 = vector.extract_strided_slice %7 {offsets = [0, 0], sizes = [16, 8], strides = [1, 1]} : vector<16x64xf32> to vector<16x8xf32>
    %28 = vector.extract_strided_slice %7 {offsets = [0, 8], sizes = [16, 8], strides = [1, 1]} : vector<16x64xf32> to vector<16x8xf32>
    %29 = vector.extract_strided_slice %9 {offsets = [0, 0], sizes = [16, 8], strides = [1, 1]} : vector<16x64xf32> to vector<16x8xf32>
    %30 = vector.extract_strided_slice %9 {offsets = [0, 8], sizes = [16, 8], strides = [1, 1]} : vector<16x64xf32> to vector<16x8xf32>
    %31 = vector.extract_strided_slice %11 {offsets = [0, 0], sizes = [16, 8], strides = [1, 1]} : vector<16x32xf32> to vector<16x8xf32>
    %cst_22 = arith.constant 2.500000e-01 : f32
    %32 = vector.broadcast %cst_22 : f32 to vector<16x16xf32>
    %33 = arith.mulf %32, %26 : vector<16x16xf32>
    %34 = arith.subf %24, %33 : vector<16x16xf32>
    %cst_23 = arith.constant dense<0.000000e+00> : vector<16x16xf32>
    %35 = tpu.matmul %27, %29, %cst_23 {dimension_numbers = #tpu.dot_dimension_numbers<[1], [1], [0], [0], [0, 0, 1, 0], [], []>} : vector<16x8xf32>, vector<16x8xf32>, vector<16x16xf32> -> vector<16x16xf32>
    %36 = arith.addf %35, %34 : vector<16x16xf32>
    %cst_24 = arith.constant dense<0.000000e+00> : vector<16x16xf32>
    %37 = tpu.matmul %28, %30, %cst_24 {dimension_numbers = #tpu.dot_dimension_numbers<[1], [1], [0], [0], [0, 0, 1, 0], [], []>} : vector<16x8xf32>, vector<16x8xf32>, vector<16x16xf32> -> vector<16x16xf32>
    %38 = arith.addf %37, %34 : vector<16x16xf32>
    %cst_25 = arith.constant dense<0xFF800000> : vector<16xf32>
    %39 = vector.multi_reduction <maximumf>, %36, %cst_25 [1] : vector<16x16xf32> to vector<16xf32>
    %40 = vector.shape_cast %39 : vector<16xf32> to vector<16x1xf32>
    %41 = vector.broadcast %40 : vector<16x1xf32> to vector<16x16xf32>
    %42 = arith.subf %36, %41 : vector<16x16xf32>
    %43 = math.exp %42 : vector<16x16xf32>
    %cst_26 = arith.constant dense<0.000000e+00> : vector<16xf32>
    %44 = vector.multi_reduction <add>, %43, %cst_26 [1] : vector<16x16xf32> to vector<16xf32>
    %45 = vector.shape_cast %44 : vector<16xf32> to vector<16x1xf32>
    %46 = tpu.reciprocal %45 {approx = true} : vector<16x1xf32> -> vector<16x1xf32>
    %47 = vector.broadcast %46 : vector<16x1xf32> to vector<16x16xf32>
    %48 = arith.mulf %43, %47 : vector<16x16xf32>
    %cst_27 = arith.constant dense<0xFF800000> : vector<16xf32>
    %49 = vector.multi_reduction <maximumf>, %38, %cst_27 [1] : vector<16x16xf32> to vector<16xf32>
    %50 = vector.shape_cast %49 : vector<16xf32> to vector<16x1xf32>
    %51 = vector.broadcast %50 : vector<16x1xf32> to vector<16x16xf32>
    %52 = arith.subf %38, %51 : vector<16x16xf32>
    %53 = math.exp %52 : vector<16x16xf32>
    %cst_28 = arith.constant dense<0.000000e+00> : vector<16xf32>
    %54 = vector.multi_reduction <add>, %53, %cst_28 [1] : vector<16x16xf32> to vector<16xf32>
    %55 = vector.shape_cast %54 : vector<16xf32> to vector<16x1xf32>
    %56 = tpu.reciprocal %55 {approx = true} : vector<16x1xf32> -> vector<16x1xf32>
    %57 = vector.broadcast %56 : vector<16x1xf32> to vector<16x16xf32>
    %58 = arith.mulf %53, %57 : vector<16x16xf32>
    %59 = vector.broadcast %0 : f32 to vector<16x16xf32>
    %60 = arith.mulf %59, %58 : vector<16x16xf32>
    %61 = arith.subf %48, %60 : vector<16x16xf32>
    %cst_29 = arith.constant dense<0.000000e+00> : vector<16x8xf32>
    %62 = tpu.matmul %61, %31, %cst_29 {dimension_numbers = #tpu.dot_dimension_numbers<[1], [0], [0], [1], [0, 0, 1, 1], [], []>} : vector<16x16xf32>, vector<16x8xf32>, vector<16x8xf32> -> vector<16x8xf32>
    %63 = vector.shape_cast %62 : vector<16x8xf32> to vector<1x16x8xf32>
    %cst_30 = arith.constant dense<0.000000e+00> : vector<1xf32>
    %64 = vector.multi_reduction <add>, %63, %cst_30 [1, 2] : vector<1x16x8xf32> to vector<1xf32>
    %65 = vector.shape_cast %64 : vector<1xf32> to vector<1x1x1xf32>
    %66 = vector.extract %65[0, 0, 0] : f32 from vector<1x1x1xf32>
    %67 = vector.broadcast %66 : f32 to vector<1x1xf32>
    %68 = arith.mulf %62, %62 : vector<16x8xf32>
    %69 = vector.shape_cast %68 : vector<16x8xf32> to vector<1x16x8xf32>
    %cst_31 = arith.constant dense<0.000000e+00> : vector<1xf32>
    %70 = vector.multi_reduction <add>, %69, %cst_31 [1, 2] : vector<1x16x8xf32> to vector<1xf32>
    %71 = vector.shape_cast %70 : vector<1xf32> to vector<1x1x1xf32>
    %72 = vector.extract %71[0, 0, 0] : f32 from vector<1x1x1xf32>
    %73 = vector.broadcast %72 : f32 to vector<1x1xf32>
    %74 = vector.extract_strided_slice %7 {offsets = [0, 16], sizes = [16, 8], strides = [1, 1]} : vector<16x64xf32> to vector<16x8xf32>
    %75 = vector.extract_strided_slice %7 {offsets = [0, 24], sizes = [16, 8], strides = [1, 1]} : vector<16x64xf32> to vector<16x8xf32>
    %76 = vector.extract_strided_slice %9 {offsets = [0, 16], sizes = [16, 8], strides = [1, 1]} : vector<16x64xf32> to vector<16x8xf32>
    %77 = vector.extract_strided_slice %9 {offsets = [0, 24], sizes = [16, 8], strides = [1, 1]} : vector<16x64xf32> to vector<16x8xf32>
    %78 = vector.extract_strided_slice %11 {offsets = [0, 8], sizes = [16, 8], strides = [1, 1]} : vector<16x32xf32> to vector<16x8xf32>
    %cst_32 = arith.constant 6.250000e-02 : f32
    %79 = vector.broadcast %cst_32 : f32 to vector<16x16xf32>
    %80 = arith.mulf %79, %26 : vector<16x16xf32>
    %81 = arith.subf %24, %80 : vector<16x16xf32>
    %cst_33 = arith.constant dense<0.000000e+00> : vector<16x16xf32>
    %82 = tpu.matmul %74, %76, %cst_33 {dimension_numbers = #tpu.dot_dimension_numbers<[1], [1], [0], [0], [0, 0, 1, 0], [], []>} : vector<16x8xf32>, vector<16x8xf32>, vector<16x16xf32> -> vector<16x16xf32>
    %83 = arith.addf %82, %81 : vector<16x16xf32>
    %cst_34 = arith.constant dense<0.000000e+00> : vector<16x16xf32>
    %84 = tpu.matmul %75, %77, %cst_34 {dimension_numbers = #tpu.dot_dimension_numbers<[1], [1], [0], [0], [0, 0, 1, 0], [], []>} : vector<16x8xf32>, vector<16x8xf32>, vector<16x16xf32> -> vector<16x16xf32>
    %85 = arith.addf %84, %81 : vector<16x16xf32>
    %cst_35 = arith.constant dense<0xFF800000> : vector<16xf32>
    %86 = vector.multi_reduction <maximumf>, %83, %cst_35 [1] : vector<16x16xf32> to vector<16xf32>
    %87 = vector.shape_cast %86 : vector<16xf32> to vector<16x1xf32>
    %88 = vector.broadcast %87 : vector<16x1xf32> to vector<16x16xf32>
    %89 = arith.subf %83, %88 : vector<16x16xf32>
    %90 = math.exp %89 : vector<16x16xf32>
    %cst_36 = arith.constant dense<0.000000e+00> : vector<16xf32>
    %91 = vector.multi_reduction <add>, %90, %cst_36 [1] : vector<16x16xf32> to vector<16xf32>
    %92 = vector.shape_cast %91 : vector<16xf32> to vector<16x1xf32>
    %93 = tpu.reciprocal %92 {approx = true} : vector<16x1xf32> -> vector<16x1xf32>
    %94 = vector.broadcast %93 : vector<16x1xf32> to vector<16x16xf32>
    %95 = arith.mulf %90, %94 : vector<16x16xf32>
    %cst_37 = arith.constant dense<0xFF800000> : vector<16xf32>
    %96 = vector.multi_reduction <maximumf>, %85, %cst_37 [1] : vector<16x16xf32> to vector<16xf32>
    %97 = vector.shape_cast %96 : vector<16xf32> to vector<16x1xf32>
    %98 = vector.broadcast %97 : vector<16x1xf32> to vector<16x16xf32>
    %99 = arith.subf %85, %98 : vector<16x16xf32>
    %100 = math.exp %99 : vector<16x16xf32>
    %cst_38 = arith.constant dense<0.000000e+00> : vector<16xf32>
    %101 = vector.multi_reduction <add>, %100, %cst_38 [1] : vector<16x16xf32> to vector<16xf32>
    %102 = vector.shape_cast %101 : vector<16xf32> to vector<16x1xf32>
    %103 = tpu.reciprocal %102 {approx = true} : vector<16x1xf32> -> vector<16x1xf32>
    %104 = vector.broadcast %103 : vector<16x1xf32> to vector<16x16xf32>
    %105 = arith.mulf %100, %104 : vector<16x16xf32>
    %106 = vector.broadcast %0 : f32 to vector<16x16xf32>
    %107 = arith.mulf %106, %105 : vector<16x16xf32>
    %108 = arith.subf %95, %107 : vector<16x16xf32>
    %cst_39 = arith.constant dense<0.000000e+00> : vector<16x8xf32>
    %109 = tpu.matmul %108, %78, %cst_39 {dimension_numbers = #tpu.dot_dimension_numbers<[1], [0], [0], [1], [0, 0, 1, 1], [], []>} : vector<16x16xf32>, vector<16x8xf32>, vector<16x8xf32> -> vector<16x8xf32>
    %110 = vector.shape_cast %109 : vector<16x8xf32> to vector<1x16x8xf32>
    %cst_40 = arith.constant dense<0.000000e+00> : vector<1xf32>
    %111 = vector.multi_reduction <add>, %110, %cst_40 [1, 2] : vector<1x16x8xf32> to vector<1xf32>
    %112 = vector.shape_cast %111 : vector<1xf32> to vector<1x1x1xf32>
    %113 = vector.extract %112[0, 0, 0] : f32 from vector<1x1x1xf32>
    %114 = vector.broadcast %113 : f32 to vector<1x1xf32>
    %115 = arith.mulf %109, %109 : vector<16x8xf32>
    %116 = vector.shape_cast %115 : vector<16x8xf32> to vector<1x16x8xf32>
    %cst_41 = arith.constant dense<0.000000e+00> : vector<1xf32>
    %117 = vector.multi_reduction <add>, %116, %cst_41 [1, 2] : vector<1x16x8xf32> to vector<1xf32>
    %118 = vector.shape_cast %117 : vector<1xf32> to vector<1x1x1xf32>
    %119 = vector.extract %118[0, 0, 0] : f32 from vector<1x1x1xf32>
    %120 = vector.broadcast %119 : f32 to vector<1x1xf32>
    %121 = vector.extract_strided_slice %7 {offsets = [0, 32], sizes = [16, 8], strides = [1, 1]} : vector<16x64xf32> to vector<16x8xf32>
    %122 = vector.extract_strided_slice %7 {offsets = [0, 40], sizes = [16, 8], strides = [1, 1]} : vector<16x64xf32> to vector<16x8xf32>
    %123 = vector.extract_strided_slice %9 {offsets = [0, 32], sizes = [16, 8], strides = [1, 1]} : vector<16x64xf32> to vector<16x8xf32>
    %124 = vector.extract_strided_slice %9 {offsets = [0, 40], sizes = [16, 8], strides = [1, 1]} : vector<16x64xf32> to vector<16x8xf32>
    %125 = vector.extract_strided_slice %11 {offsets = [0, 16], sizes = [16, 8], strides = [1, 1]} : vector<16x32xf32> to vector<16x8xf32>
    %cst_42 = arith.constant 1.562500e-02 : f32
    %126 = vector.broadcast %cst_42 : f32 to vector<16x16xf32>
    %127 = arith.mulf %126, %26 : vector<16x16xf32>
    %128 = arith.subf %24, %127 : vector<16x16xf32>
    %cst_43 = arith.constant dense<0.000000e+00> : vector<16x16xf32>
    %129 = tpu.matmul %121, %123, %cst_43 {dimension_numbers = #tpu.dot_dimension_numbers<[1], [1], [0], [0], [0, 0, 1, 0], [], []>} : vector<16x8xf32>, vector<16x8xf32>, vector<16x16xf32> -> vector<16x16xf32>
    %130 = arith.addf %129, %128 : vector<16x16xf32>
    %cst_44 = arith.constant dense<0.000000e+00> : vector<16x16xf32>
    %131 = tpu.matmul %122, %124, %cst_44 {dimension_numbers = #tpu.dot_dimension_numbers<[1], [1], [0], [0], [0, 0, 1, 0], [], []>} : vector<16x8xf32>, vector<16x8xf32>, vector<16x16xf32> -> vector<16x16xf32>
    %132 = arith.addf %131, %128 : vector<16x16xf32>
    %cst_45 = arith.constant dense<0xFF800000> : vector<16xf32>
    %133 = vector.multi_reduction <maximumf>, %130, %cst_45 [1] : vector<16x16xf32> to vector<16xf32>
    %134 = vector.shape_cast %133 : vector<16xf32> to vector<16x1xf32>
    %135 = vector.broadcast %134 : vector<16x1xf32> to vector<16x16xf32>
    %136 = arith.subf %130, %135 : vector<16x16xf32>
    %137 = math.exp %136 : vector<16x16xf32>
    %cst_46 = arith.constant dense<0.000000e+00> : vector<16xf32>
    %138 = vector.multi_reduction <add>, %137, %cst_46 [1] : vector<16x16xf32> to vector<16xf32>
    %139 = vector.shape_cast %138 : vector<16xf32> to vector<16x1xf32>
    %140 = tpu.reciprocal %139 {approx = true} : vector<16x1xf32> -> vector<16x1xf32>
    %141 = vector.broadcast %140 : vector<16x1xf32> to vector<16x16xf32>
    %142 = arith.mulf %137, %141 : vector<16x16xf32>
    %cst_47 = arith.constant dense<0xFF800000> : vector<16xf32>
    %143 = vector.multi_reduction <maximumf>, %132, %cst_47 [1] : vector<16x16xf32> to vector<16xf32>
    %144 = vector.shape_cast %143 : vector<16xf32> to vector<16x1xf32>
    %145 = vector.broadcast %144 : vector<16x1xf32> to vector<16x16xf32>
    %146 = arith.subf %132, %145 : vector<16x16xf32>
    %147 = math.exp %146 : vector<16x16xf32>
    %cst_48 = arith.constant dense<0.000000e+00> : vector<16xf32>
    %148 = vector.multi_reduction <add>, %147, %cst_48 [1] : vector<16x16xf32> to vector<16xf32>
    %149 = vector.shape_cast %148 : vector<16xf32> to vector<16x1xf32>
    %150 = tpu.reciprocal %149 {approx = true} : vector<16x1xf32> -> vector<16x1xf32>
    %151 = vector.broadcast %150 : vector<16x1xf32> to vector<16x16xf32>
    %152 = arith.mulf %147, %151 : vector<16x16xf32>
    %153 = vector.broadcast %0 : f32 to vector<16x16xf32>
    %154 = arith.mulf %153, %152 : vector<16x16xf32>
    %155 = arith.subf %142, %154 : vector<16x16xf32>
    %cst_49 = arith.constant dense<0.000000e+00> : vector<16x8xf32>
    %156 = tpu.matmul %155, %125, %cst_49 {dimension_numbers = #tpu.dot_dimension_numbers<[1], [0], [0], [1], [0, 0, 1, 1], [], []>} : vector<16x16xf32>, vector<16x8xf32>, vector<16x8xf32> -> vector<16x8xf32>
    %157 = vector.shape_cast %156 : vector<16x8xf32> to vector<1x16x8xf32>
    %cst_50 = arith.constant dense<0.000000e+00> : vector<1xf32>
    %158 = vector.multi_reduction <add>, %157, %cst_50 [1, 2] : vector<1x16x8xf32> to vector<1xf32>
    %159 = vector.shape_cast %158 : vector<1xf32> to vector<1x1x1xf32>
    %160 = vector.extract %159[0, 0, 0] : f32 from vector<1x1x1xf32>
    %161 = vector.broadcast %160 : f32 to vector<1x1xf32>
    %162 = arith.mulf %156, %156 : vector<16x8xf32>
    %163 = vector.shape_cast %162 : vector<16x8xf32> to vector<1x16x8xf32>
    %cst_51 = arith.constant dense<0.000000e+00> : vector<1xf32>
    %164 = vector.multi_reduction <add>, %163, %cst_51 [1, 2] : vector<1x16x8xf32> to vector<1xf32>
    %165 = vector.shape_cast %164 : vector<1xf32> to vector<1x1x1xf32>
    %166 = vector.extract %165[0, 0, 0] : f32 from vector<1x1x1xf32>
    %167 = vector.broadcast %166 : f32 to vector<1x1xf32>
    %168 = vector.extract_strided_slice %7 {offsets = [0, 48], sizes = [16, 8], strides = [1, 1]} : vector<16x64xf32> to vector<16x8xf32>
    %169 = vector.extract_strided_slice %7 {offsets = [0, 56], sizes = [16, 8], strides = [1, 1]} : vector<16x64xf32> to vector<16x8xf32>
    %170 = vector.extract_strided_slice %9 {offsets = [0, 48], sizes = [16, 8], strides = [1, 1]} : vector<16x64xf32> to vector<16x8xf32>
    %171 = vector.extract_strided_slice %9 {offsets = [0, 56], sizes = [16, 8], strides = [1, 1]} : vector<16x64xf32> to vector<16x8xf32>
    %172 = vector.extract_strided_slice %11 {offsets = [0, 24], sizes = [16, 8], strides = [1, 1]} : vector<16x32xf32> to vector<16x8xf32>
    %cst_52 = arith.constant 3.906250e-03 : f32
    %173 = vector.broadcast %cst_52 : f32 to vector<16x16xf32>
    %174 = arith.mulf %173, %26 : vector<16x16xf32>
    %175 = arith.subf %24, %174 : vector<16x16xf32>
    %cst_53 = arith.constant dense<0.000000e+00> : vector<16x16xf32>
    %176 = tpu.matmul %168, %170, %cst_53 {dimension_numbers = #tpu.dot_dimension_numbers<[1], [1], [0], [0], [0, 0, 1, 0], [], []>} : vector<16x8xf32>, vector<16x8xf32>, vector<16x16xf32> -> vector<16x16xf32>
    %177 = arith.addf %176, %175 : vector<16x16xf32>
    %cst_54 = arith.constant dense<0.000000e+00> : vector<16x16xf32>
    %178 = tpu.matmul %169, %171, %cst_54 {dimension_numbers = #tpu.dot_dimension_numbers<[1], [1], [0], [0], [0, 0, 1, 0], [], []>} : vector<16x8xf32>, vector<16x8xf32>, vector<16x16xf32> -> vector<16x16xf32>
    %179 = arith.addf %178, %175 : vector<16x16xf32>
    %cst_55 = arith.constant dense<0xFF800000> : vector<16xf32>
    %180 = vector.multi_reduction <maximumf>, %177, %cst_55 [1] : vector<16x16xf32> to vector<16xf32>
    %181 = vector.shape_cast %180 : vector<16xf32> to vector<16x1xf32>
    %182 = vector.broadcast %181 : vector<16x1xf32> to vector<16x16xf32>
    %183 = arith.subf %177, %182 : vector<16x16xf32>
    %184 = math.exp %183 : vector<16x16xf32>
    %cst_56 = arith.constant dense<0.000000e+00> : vector<16xf32>
    %185 = vector.multi_reduction <add>, %184, %cst_56 [1] : vector<16x16xf32> to vector<16xf32>
    %186 = vector.shape_cast %185 : vector<16xf32> to vector<16x1xf32>
    %187 = tpu.reciprocal %186 {approx = true} : vector<16x1xf32> -> vector<16x1xf32>
    %188 = vector.broadcast %187 : vector<16x1xf32> to vector<16x16xf32>
    %189 = arith.mulf %184, %188 : vector<16x16xf32>
    %cst_57 = arith.constant dense<0xFF800000> : vector<16xf32>
    %190 = vector.multi_reduction <maximumf>, %179, %cst_57 [1] : vector<16x16xf32> to vector<16xf32>
    %191 = vector.shape_cast %190 : vector<16xf32> to vector<16x1xf32>
    %192 = vector.broadcast %191 : vector<16x1xf32> to vector<16x16xf32>
    %193 = arith.subf %179, %192 : vector<16x16xf32>
    %194 = math.exp %193 : vector<16x16xf32>
    %cst_58 = arith.constant dense<0.000000e+00> : vector<16xf32>
    %195 = vector.multi_reduction <add>, %194, %cst_58 [1] : vector<16x16xf32> to vector<16xf32>
    %196 = vector.shape_cast %195 : vector<16xf32> to vector<16x1xf32>
    %197 = tpu.reciprocal %196 {approx = true} : vector<16x1xf32> -> vector<16x1xf32>
    %198 = vector.broadcast %197 : vector<16x1xf32> to vector<16x16xf32>
    %199 = arith.mulf %194, %198 : vector<16x16xf32>
    %200 = vector.broadcast %0 : f32 to vector<16x16xf32>
    %201 = arith.mulf %200, %199 : vector<16x16xf32>
    %202 = arith.subf %189, %201 : vector<16x16xf32>
    %cst_59 = arith.constant dense<0.000000e+00> : vector<16x8xf32>
    %203 = tpu.matmul %202, %172, %cst_59 {dimension_numbers = #tpu.dot_dimension_numbers<[1], [0], [0], [1], [0, 0, 1, 1], [], []>} : vector<16x16xf32>, vector<16x8xf32>, vector<16x8xf32> -> vector<16x8xf32>
    %204 = vector.shape_cast %203 : vector<16x8xf32> to vector<1x16x8xf32>
    %cst_60 = arith.constant dense<0.000000e+00> : vector<1xf32>
    %205 = vector.multi_reduction <add>, %204, %cst_60 [1, 2] : vector<1x16x8xf32> to vector<1xf32>
    %206 = vector.shape_cast %205 : vector<1xf32> to vector<1x1x1xf32>
    %207 = vector.extract %206[0, 0, 0] : f32 from vector<1x1x1xf32>
    %208 = vector.broadcast %207 : f32 to vector<1x1xf32>
    %209 = arith.mulf %203, %203 : vector<16x8xf32>
    %210 = vector.shape_cast %209 : vector<16x8xf32> to vector<1x16x8xf32>
    %cst_61 = arith.constant dense<0.000000e+00> : vector<1xf32>
    %211 = vector.multi_reduction <add>, %210, %cst_61 [1, 2] : vector<1x16x8xf32> to vector<1xf32>
    %212 = vector.shape_cast %211 : vector<1xf32> to vector<1x1x1xf32>
    %213 = vector.extract %212[0, 0, 0] : f32 from vector<1x1x1xf32>
    %214 = vector.broadcast %213 : f32 to vector<1x1xf32>
    %cst_62 = arith.constant 7.812500e-03 : f32
    %215 = vector.broadcast %cst_62 : f32 to vector<1x1xf32>
    %216 = arith.mulf %67, %215 : vector<1x1xf32>
    %cst_63 = arith.constant 7.812500e-03 : f32
    %217 = vector.broadcast %cst_63 : f32 to vector<1x1xf32>
    %218 = arith.mulf %73, %217 : vector<1x1xf32>
    %219 = arith.mulf %216, %216 : vector<1x1xf32>
    %220 = arith.subf %218, %219 : vector<1x1xf32>
    %221 = vector.broadcast %216 : vector<1x1xf32> to vector<16x8xf32>
    %222 = arith.subf %62, %221 : vector<16x8xf32>
    %cst_64 = arith.constant 9.99999974E-6 : f32
    %223 = vector.broadcast %cst_64 : f32 to vector<1x1xf32>
    %224 = arith.addf %220, %223 : vector<1x1xf32>
    %225 = math.rsqrt %224 : vector<1x1xf32>
    %226 = vector.broadcast %225 : vector<1x1xf32> to vector<16x8xf32>
    %227 = arith.mulf %222, %226 : vector<16x8xf32>
    %228 = vector.extract_strided_slice %1 {offsets = [0, 0], sizes = [1, 8], strides = [1, 1]} : vector<1x32xf32> to vector<1x8xf32>
    %229 = vector.broadcast %228 : vector<1x8xf32> to vector<16x8xf32>
    %230 = arith.mulf %227, %229 : vector<16x8xf32>
    %231 = vector.extract_strided_slice %2 {offsets = [0, 0], sizes = [1, 8], strides = [1, 1]} : vector<1x32xf32> to vector<1x8xf32>
    %232 = vector.broadcast %231 : vector<1x8xf32> to vector<16x8xf32>
    %233 = arith.addf %230, %232 : vector<16x8xf32>
    %c0_65 = arith.constant 0 : index
    %c0_66 = arith.constant 0 : index
    %234 = vector.load %arg11[%c0_65, %c0_66] : memref<16x32xf32, #tpu.memory_space<vmem>>, vector<16x8xf32>
    tpu.vector_store %arg11[%c0_65, %c0_66], %233 {strides = array<i32>} : memref<16x32xf32, #tpu.memory_space<vmem>>, vector<16x8xf32>,
    %cst_67 = arith.constant 7.812500e-03 : f32
    %235 = vector.broadcast %cst_67 : f32 to vector<1x1xf32>
    %236 = arith.mulf %114, %235 : vector<1x1xf32>
    %cst_68 = arith.constant 7.812500e-03 : f32
    %237 = vector.broadcast %cst_68 : f32 to vector<1x1xf32>
    %238 = arith.mulf %120, %237 : vector<1x1xf32>
    %239 = arith.mulf %236, %236 : vector<1x1xf32>
    %240 = arith.subf %238, %239 : vector<1x1xf32>
    %241 = vector.broadcast %236 : vector<1x1xf32> to vector<16x8xf32>
    %242 = arith.subf %109, %241 : vector<16x8xf32>
    %cst_69 = arith.constant 9.99999974E-6 : f32
    %243 = vector.broadcast %cst_69 : f32 to vector<1x1xf32>
    %244 = arith.addf %240, %243 : vector<1x1xf32>
    %245 = math.rsqrt %244 : vector<1x1xf32>
    %246 = vector.broadcast %245 : vector<1x1xf32> to vector<16x8xf32>
    %247 = arith.mulf %242, %246 : vector<16x8xf32>
    %248 = vector.extract_strided_slice %1 {offsets = [0, 8], sizes = [1, 8], strides = [1, 1]} : vector<1x32xf32> to vector<1x8xf32>
    %249 = vector.broadcast %248 : vector<1x8xf32> to vector<16x8xf32>
    %250 = arith.mulf %247, %249 : vector<16x8xf32>
    %251 = vector.extract_strided_slice %2 {offsets = [0, 8], sizes = [1, 8], strides = [1, 1]} : vector<1x32xf32> to vector<1x8xf32>
    %252 = vector.broadcast %251 : vector<1x8xf32> to vector<16x8xf32>
    %253 = arith.addf %250, %252 : vector<16x8xf32>
    %c0_70 = arith.constant 0 : index
    %c8 = arith.constant 8 : index
    %254 = vector.load %arg11[%c0_70, %c8] : memref<16x32xf32, #tpu.memory_space<vmem>>, vector<16x8xf32>
    tpu.vector_store %arg11[%c0_70, %c8], %253 {strides = array<i32>} : memref<16x32xf32, #tpu.memory_space<vmem>>, vector<16x8xf32>,
    %cst_71 = arith.constant 7.812500e-03 : f32
    %255 = vector.broadcast %cst_71 : f32 to vector<1x1xf32>
    %256 = arith.mulf %161, %255 : vector<1x1xf32>
    %cst_72 = arith.constant 7.812500e-03 : f32
    %257 = vector.broadcast %cst_72 : f32 to vector<1x1xf32>
    %258 = arith.mulf %167, %257 : vector<1x1xf32>
    %259 = arith.mulf %256, %256 : vector<1x1xf32>
    %260 = arith.subf %258, %259 : vector<1x1xf32>
    %261 = vector.broadcast %256 : vector<1x1xf32> to vector<16x8xf32>
    %262 = arith.subf %156, %261 : vector<16x8xf32>
    %cst_73 = arith.constant 9.99999974E-6 : f32
    %263 = vector.broadcast %cst_73 : f32 to vector<1x1xf32>
    %264 = arith.addf %260, %263 : vector<1x1xf32>
    %265 = math.rsqrt %264 : vector<1x1xf32>
    %266 = vector.broadcast %265 : vector<1x1xf32> to vector<16x8xf32>
    %267 = arith.mulf %262, %266 : vector<16x8xf32>
    %268 = vector.extract_strided_slice %1 {offsets = [0, 16], sizes = [1, 8], strides = [1, 1]} : vector<1x32xf32> to vector<1x8xf32>
    %269 = vector.broadcast %268 : vector<1x8xf32> to vector<16x8xf32>
    %270 = arith.mulf %267, %269 : vector<16x8xf32>
    %271 = vector.extract_strided_slice %2 {offsets = [0, 16], sizes = [1, 8], strides = [1, 1]} : vector<1x32xf32> to vector<1x8xf32>
    %272 = vector.broadcast %271 : vector<1x8xf32> to vector<16x8xf32>
    %273 = arith.addf %270, %272 : vector<16x8xf32>
    %c0_74 = arith.constant 0 : index
    %c16 = arith.constant 16 : index
    %274 = vector.load %arg11[%c0_74, %c16] : memref<16x32xf32, #tpu.memory_space<vmem>>, vector<16x8xf32>
    tpu.vector_store %arg11[%c0_74, %c16], %273 {strides = array<i32>} : memref<16x32xf32, #tpu.memory_space<vmem>>, vector<16x8xf32>,
    %cst_75 = arith.constant 7.812500e-03 : f32
    %275 = vector.broadcast %cst_75 : f32 to vector<1x1xf32>
    %276 = arith.mulf %208, %275 : vector<1x1xf32>
    %cst_76 = arith.constant 7.812500e-03 : f32
    %277 = vector.broadcast %cst_76 : f32 to vector<1x1xf32>
    %278 = arith.mulf %214, %277 : vector<1x1xf32>
    %279 = arith.mulf %276, %276 : vector<1x1xf32>
    %280 = arith.subf %278, %279 : vector<1x1xf32>
    %281 = vector.broadcast %276 : vector<1x1xf32> to vector<16x8xf32>
    %282 = arith.subf %203, %281 : vector<16x8xf32>
    %cst_77 = arith.constant 9.99999974E-6 : f32
    %283 = vector.broadcast %cst_77 : f32 to vector<1x1xf32>
    %284 = arith.addf %280, %283 : vector<1x1xf32>
    %285 = math.rsqrt %284 : vector<1x1xf32>
    %286 = vector.broadcast %285 : vector<1x1xf32> to vector<16x8xf32>
    %287 = arith.mulf %282, %286 : vector<16x8xf32>
    %288 = vector.extract_strided_slice %1 {offsets = [0, 24], sizes = [1, 8], strides = [1, 1]} : vector<1x32xf32> to vector<1x8xf32>
    %289 = vector.broadcast %288 : vector<1x8xf32> to vector<16x8xf32>
    %290 = arith.mulf %287, %289 : vector<16x8xf32>
    %291 = vector.extract_strided_slice %2 {offsets = [0, 24], sizes = [1, 8], strides = [1, 1]} : vector<1x32xf32> to vector<1x8xf32>
    %292 = vector.broadcast %291 : vector<1x8xf32> to vector<16x8xf32>
    %293 = arith.addf %290, %292 : vector<16x8xf32>
    %c0_78 = arith.constant 0 : index
    %c24 = arith.constant 24 : index
    %294 = vector.load %arg11[%c0_78, %c24] : memref<16x32xf32, #tpu.memory_space<vmem>>, vector<16x8xf32>
    tpu.vector_store %arg11[%c0_78, %c24], %293 {strides = array<i32>} : memref<16x32xf32, #tpu.memory_space<vmem>>, vector<16x8xf32>,
    %c0_79 = arith.constant 0 : index
    %c0_80 = arith.constant 0 : index
    %295 = vector.load %arg11[%c0_79, %c0_80] : memref<16x32xf32, #tpu.memory_space<vmem>>, vector<16x32xf32>
    %c0_81 = arith.constant 0 : index
    %c0_82 = arith.constant 0 : index
    %296 = vector.load %arg7[%c0_81, %c0_82] : memref<32x32xf32, #tpu.memory_space<vmem>>, vector<32x32xf32>
    %cst_83 = arith.constant dense<0.000000e+00> : vector<16x32xf32>
    %297 = tpu.matmul %295, %296, %cst_83 {dimension_numbers = #tpu.dot_dimension_numbers<[1], [0], [0], [1], [0, 0, 1, 1], [], []>} : vector<16x32xf32>, vector<32x32xf32>, vector<16x32xf32> -> vector<16x32xf32>
    %298 = vector.shape_cast %297 : vector<16x32xf32> to vector<1x16x32xf32>
    %c0_84 = arith.constant 0 : index
    %c0_85 = arith.constant 0 : index
    %c0_86 = arith.constant 0 : index
    %299 = vector.load %arg10[%c0_84, %c0_85, %c0_86] : memref<1x16x32xf32, #tpu.memory_space<vmem>>, vector<1x16x32xf32>
    tpu.vector_store %arg10[%c0_84, %c0_85, %c0_86], %298 {strides = array<i32>} : memref<1x16x32xf32, #tpu.memory_space<vmem>>, vector<1x16x32xf32>,
    return
  }
  func.func @transform_0(%arg0: i32, %arg1: memref<1xf32, #tpu.memory_space<smem>>) -> (i32, i32, i32) {
    %c0_i32 = arith.constant 0 : i32
    %c0_i32_0 = arith.constant 0 : i32
    %c0_i32_1 = arith.constant 0 : i32
    return %arg0, %c0_i32, %c0_i32_0 : i32, i32, i32
  }
  func.func @transform_1(%arg0: i32, %arg1: memref<1xf32, #tpu.memory_space<smem>>) -> (i32, i32, i32) {
    %c0_i32 = arith.constant 0 : i32
    %c0_i32_0 = arith.constant 0 : i32
    %c0_i32_1 = arith.constant 0 : i32
    return %arg0, %c0_i32, %c0_i32_0 : i32, i32, i32
  }
  func.func @transform_2(%arg0: i32, %arg1: memref<1xf32, #tpu.memory_space<smem>>) -> (i32, i32) {
    %c0_i32 = arith.constant 0 : i32
    %c0_i32_0 = arith.constant 0 : i32
    %c0_i32_1 = arith.constant 0 : i32
    return %c0_i32, %c0_i32_0 : i32, i32
  }
  func.func @transform_3(%arg0: i32, %arg1: memref<1xf32, #tpu.memory_space<smem>>) -> (i32, i32) {
    %c0_i32 = arith.constant 0 : i32
    %c0_i32_0 = arith.constant 0 : i32
    %c0_i32_1 = arith.constant 0 : i32
    return %c0_i32, %c0_i32_0 : i32, i32
  }
  func.func @transform_4(%arg0: i32, %arg1: memref<1xf32, #tpu.memory_space<smem>>) -> (i32, i32) {
    %c0_i32 = arith.constant 0 : i32
    %c0_i32_0 = arith.constant 0 : i32
    %c0_i32_1 = arith.constant 0 : i32
    return %c0_i32, %c0_i32_0 : i32, i32
  }
  func.func @transform_5(%arg0: i32, %arg1: memref<1xf32, #tpu.memory_space<smem>>) -> (i32, i32) {
    %c0_i32 = arith.constant 0 : i32
    %c0_i32_0 = arith.constant 0 : i32
    %c0_i32_1 = arith.constant 0 : i32
    return %c0_i32, %c0_i32_0 : i32, i32
  }
  func.func @transform_6(%arg0: i32, %arg1: memref<1xf32, #tpu.memory_space<smem>>) -> (i32, i32) {
    %c0_i32 = arith.constant 0 : i32
    %c0_i32_0 = arith.constant 0 : i32
    %c0_i32_1 = arith.constant 0 : i32
    return %c0_i32, %c0_i32_0 : i32, i32
  }
  func.func @transform_7(%arg0: i32, %arg1: memref<1xf32, #tpu.memory_space<smem>>) -> (i32, i32) {
    %c0_i32 = arith.constant 0 : i32
    %c0_i32_0 = arith.constant 0 : i32
    %c0_i32_1 = arith.constant 0 : i32
    return %c0_i32, %c0_i32_0 : i32, i32
  }
  func.func @transform_8(%arg0: i32, %arg1: memref<1xf32, #tpu.memory_space<smem>>) -> (i32, i32, i32) {
    %c0_i32 = arith.constant 0 : i32
    %c0_i32_0 = arith.constant 0 : i32
    %c0_i32_1 = arith.constant 0 : i32
    return %arg0, %c0_i32, %c0_i32_0 : i32, i32, i32
  }
}

</mosaic_0001>

<bundles_post_ra>
// kernel: tpu_custom_call.1
= control target key start
LH: loop header
LB: loop body
LE: loop exit
PB: predicated region body
PF: predicated region fallthrough
CT: control target
= control target key end

     0   :  { %s3687_s0 = inlined_call_operand.<no memory space> [shape: f32[1], index: 0, kind: input, shape index: {}]   ;;  %s3688_s1 = inlined_call_operand.hbm [shape: f32[2,16,32], index: 1, kind: input, shape index: {}]   ;;  %s3689_s2 = inlined_call_operand.vmem [shape: f32[2,1,16], index: 2, kind: input, shape index: {}]   ;;  %s3690_s3 = inlined_call_operand.hbm [shape: f32[32,64], index: 3, kind: input, shape index: {}]   ;;  %s3691_s4 = inlined_call_operand.hbm [shape: f32[32,64], index: 4, kind: input, shape index: {}]   ;;  %s3692_s5 = inlined_call_operand.hbm [shape: f32[32,32], index: 5, kind: input, shape index: {}]   ;;  %s3693_s6 = inlined_call_operand.hbm [shape: f32[32,32], index: 6, kind: input, shape index: {}]   ;;  %s3694_s7 = inlined_call_operand.vmem [shape: f32[1,32], index: 7, kind: input, shape index: {}]   ;;  %s3695_s8 = inlined_call_operand.vmem [shape: f32[1,32], index: 8, kind: input, shape index: {}]   ;;  %s3696_s9 = inlined_call_operand.hbm [shape: f32[2,16,32], index: 9, kind: output, shape index: {}]  }
   0x1   :  { %3703 = sst [smem:[#allocation19_spill]] %s3690_s3 }
   0x2   :  { %3704 = sst [smem:[#allocation20_spill]] %s3691_s4 }
   0x3   :  { %14 = sst [smem:[#allocation4]] %s3687_s0 }
   0x4   :  { %15 = vsyncpa [#allocation6], 0 }
   0x5   :  { %17 = vsyncpa [#allocation6 + $0x1], 0 }
   0x6   :  { %18 = vsyncpa [#allocation9], 0 }
   0x7   :  { %19 = vsyncpa [#allocation12], 0 }
   0x8   :  { %20 = vsyncpa [#allocation7], 0 }
   0x9   :  { %22 = vsyncpa [#allocation7 + $0x1], 0  ;;  %s3148_s11 = smov 0   ;;  %s3150_s12 = smov 0  }
   0xa   :  { %s3152_s13 = smov 0   ;;  %s3154_s14 = smov 0  }
   0xb LB: > { %s3169_s0 = sadd.s32 4294967295, %s3073_s14   ;;  %s2406_s15 = sadd.s32 4294967294, %s3073_s14   ;;  %s3073_s14 = sphi %s3154_s14, %s3727_s14   ;;  %s3069_s13 = sphi %s3152_s13, %s3726_s13   ;;  %s3065_s12 = sphi %s3150_s12, %s3725_s12   ;;  %s3061_s11 = sphi %s3148_s11, %s3724_s11  }
   0xc   : > { %p48_p0 = scmp.ne.s32.totalorder %s3065_s12, %s3061_s11  ;;  %p3697_p1 = scmp.eq.s32.totalorder %s3169_s0, 0 }
   0xd   : > { %p224_p2 = scmp.eq.s32.totalorder %s3169_s0, 1  ;;  %p230_p3 = scmp.eq.s32.totalorder %s2406_s15, 1 }
   0xe   : > { %p3178_p4 = por %p3697_p1, %p48_p0  ;;  %p2407_p5 = scmp.ge.s32.totalorder %s3073_s14, 1 }
   0xf   : > { %p3183_p6 = por %p230_p3, %p48_p0  ;;  %p237_p7 = scmp.lt.s32.totalorder %s3073_s14, 3 }
  0x10   : > { %s3705_s16 = scalar_select %p3178_p4, 1, 0 }
  0x11   : > { %s3706_s17 = scalar_select %p3183_p6, 1, 0 }
  0x12   : > { %p3188_p8 = pnand %p2407_p5, %p237_p7  ;;  %s3075_s19 = smov [#allocation8]  }
  0x13   : > { %s249_s20 = sshll.u32 %s3075_s19, 4  ;;  %s3076_s22 = smov [#allocation11]   ;;  %s250_s20 = int_to_ptr.vmem [resolvable:$true] %s249_s20 }
  0x14   : > { %s3707_s18 = scalar_select %p3188_p8, 1, 0 }
  0x15   : > { %p2716_p9 = pneg %p3188_p8  ;;  %s275_s23 = sshll.u32 %s3076_s22, 4  ;;  %s276_s23 = int_to_ptr.vmem [resolvable:$true] %s275_s23 }
  0x16   : > { %s3077_s24 = smov [#allocation10]   ;;  %s2880_s26 = scalar_lea.vmem %s250_s20, 512 }
  0x17   : > { %p3197_p11 = pnand %p2716_p9, %p3697_p1  ;;  %s262_s25 = sshll.u32 %s3077_s24, 4  ;;  %s263_s25 = int_to_ptr.vmem [resolvable:$true] %s262_s25 }
  0x18   : > { %p2881_p13 = scmp.ne.s32.totalorder %s250_s20, %s2880_s26  ;;  %p2888_p5 = scmp.lt.s32.totalorder %s250_s20, %s250_s20 }
  0x19   : > { %p2871_p12 = pneg %p3197_p11  ;;  %p2889_p7 = scmp.lt.s32.totalorder %s2880_s26, %s2880_s26 }
  0x1b   : > { %p2883_p0 = pnand %p2881_p13, %p2871_p12  ;;  %p2890_p9 = por %p2889_p7, %p2888_p5 }
  0x1d   : > { %p2884_p3 = pneg %p2883_p0 }
  0x1f   : > { %p2891_p10 = pnand %p2890_p9, %p2884_p3 }
  0x21   : > { %2894 = shalt.err (!%p2891_p10)
}
  0x22   : > { %s3698_s27 = smov 128   ;;  %s3699_s28 = smov 8  }
  0x23   : > { %s3709_s3 = sld [smem:[#allocation19_spill]]  ;;  %s2906_s10 = scalar_lea.vmem %s276_s23, 512 }
  0x24   : > { %p2907_p13 = scmp.ne.s32.totalorder %s276_s23, %s2906_s10  ;;  %p2914_p3 = scmp.lt.s32.totalorder %s276_s23, %s276_s23 }
  0x25   : > { %p2915_p10 = scmp.lt.s32.totalorder %s2906_s10, %s2906_s10 }
  0x26   : > { %p2909_p0 = pnand %p2907_p13, %p2871_p12 }
  0x27   : > { %p2916_p7 = por %p2915_p10, %p2914_p3 }
  0x28   : > { %p2910_p5 = pneg %p2909_p0 }
  0x29   : > { %2719 = dma.hbm_to_vmem [thread:$0]  (!%p3197_p11), %s3709_s3, 512, %s250_s20, [#allocation9], %s3698_s27, %s3698_s27, %s3699_s28  }
  0x2a   : > { %p2917_p9 = pnand %p2916_p7, %p2910_p5 }
  0x2c   : > { %2920 = shalt.err (!%p2917_p9)
}
  0x2d   : > { %2725 = dma.hbm_to_vmem [thread:$0]  (!%p3197_p11), %s3692_s5, 512, %s276_s23, [#allocation12], %s3698_s27, %s3698_s27, %s3699_s28  }
  0x2e   : > { %s2932_s20 = scalar_lea.vmem %s263_s25, 512  ;;  %p2940_p3 = scmp.lt.s32.totalorder %s263_s25, %s263_s25 }
  0x2f   : > { %p2933_p1 = scmp.ne.s32.totalorder %s263_s25, %s2932_s20  ;;  %p2941_p5 = scmp.lt.s32.totalorder %s2932_s20, %s2932_s20 }
  0x31   : > { %p2935_p13 = pnand %p2933_p1, %p2871_p12  ;;  %p2942_p10 = por %p2941_p5, %p2940_p3 }
  0x33   : > { %p2936_p0 = pneg %p2935_p13 }
  0x35   : > { %p2943_p7 = pnand %p2942_p10, %p2936_p0 }
  0x37   : > { %2946 = shalt.err (!%p2943_p7)
}
  0x38   : > { %s3710_s4 = sld [smem:[#allocation20_spill]]  ;;  %s3080_s23 = smov [#allocation13]  }
  0x39   : > { %s288_s26 = sshll.u32 %s3080_s23, 4  ;;  %s289_s26 = int_to_ptr.vmem [resolvable:$true] %s288_s26 }
  0x3a   : > { %s2958_s29 = scalar_lea.vmem %s289_s26, 512  ;;  %p2966_p0 = scmp.lt.s32.totalorder %s289_s26, %s289_s26 }
  0x3b   : > { %p2959_p1 = scmp.ne.s32.totalorder %s289_s26, %s2958_s29  ;;  %p2967_p3 = scmp.lt.s32.totalorder %s2958_s29, %s2958_s29 }
  0x3d   : > { %p2961_p9 = pnand %p2959_p1, %p2871_p12  ;;  %p2968_p5 = por %p2967_p3, %p2966_p0 }
  0x3e   : > { %2722 = dma.hbm_to_vmem [thread:$0]  (!%p3197_p11), %s3710_s4, 512, %s263_s25, [#allocation9], %s3698_s27, %s3698_s27, %s3699_s28  }
  0x3f   : > { %p2962_p13 = pneg %p2961_p9 }
  0x41   : > { %p2969_p10 = pnand %p2968_p5, %p2962_p13 }
  0x43   : > { %2972 = shalt.err (!%p2969_p10)
}
  0x44   : > { %2728 = dma.hbm_to_vmem [thread:$0]  (!%p3197_p11), %s3693_s6, 512, %s289_s26, [#allocation12], %s3698_s27, %s3698_s27, %s3699_s28  }
  0x45   : > { %s3248_s10 = sadd.s32 1, %s3073_s14   ;;  %s35_s21 = sadd.s32 1, %s3069_s13 }
  0x46   : > { %s32_s15 = ssub.s32 %s3073_s14, %s3248_s10  ;;  %p42_p12 = scmp.ne.s32.totalorder %s3069_s13, %s3065_s12 }
  0x47   : > { %p33_p7 = scmp.eq.s32.totalorder %s32_s15, 0  ;;  %p43_p1 = scmp.eq.s32.totalorder %s3073_s14, 0 }
  0x48   : > { %p3258_p9 = por %p224_p2, %p42_p12  ;;  %p2741_p13 = scmp.lt.s32.totalorder %s3073_s14, 2 }
  0x49   : > { %s3264_s20 = scalar_select %p33_p7, %s3069_s13, %s35_s21  }
  0x4a   : > { %s3711_s19 = scalar_select %p3258_p9, 1, 0 }
  0x4b   : > { %p44_p0 = por %p43_p1, %p42_p12  ;;  %s308_s22 = sand.u32 1, %s3069_s13  }
  0x4c   : > { %s2413_s24 = sshll.u32 %s308_s22, 4  ;;  %s2478_s23 = sshll.u32 %s3073_s14, 8 }
  0x4d   : > { %s3271_s25 = scalar_lea.hbm %s3688_s1, %s2478_s23  ;;  %s312_s30 = scalar_lea.vmem [#allocation5], %s2413_s24 }
  0x4e   : > { %s319_s15 = sshll.u32 %s312_s30, 4  ;;  %p3275_p2 = pnand %p2741_p13, %p44_p0  ;;  %s3273_s15 = int_to_ptr.vmem [resolvable:$true] %s319_s15 }
  0x4f   : > { %s3279_s21 = scalar_lea.sflag [#allocation6], %s308_s22  ;;  %s2973_s28 = scalar_lea.hbm %s3271_s25, 256 }
  0x50   : > { %p2974_p11 = scmp.ne.s32.totalorder %s3271_s25, %s2973_s28  ;;  %p2975_p3 = pneg %p3275_p2 }
  0x51   : > { %s2978_s24 = scalar_lea.hbm %s3688_s1, 512  ;;  %p2979_p12 = scmp.lt.s32.totalorder %s3271_s25, %s3688_s1 }
  0x52   : > { %p2976_p5 = pnand %p2975_p3, %p2974_p11  ;;  %p2980_p7 = scmp.lt.s32.totalorder %s2978_s24, %s2973_s28 }
  0x54   : > { %p2977_p10 = pneg %p2976_p5  ;;  %p2981_p1 = por %p2980_p7, %p2979_p12 }
  0x56   : > { %p2982_p13 = pnand %p2981_p1, %p2977_p10 }
  0x58   : > { %2985 = shalt.err (!%p2982_p13)
}
  0x59   : > { %s2986_s22 = scalar_lea.vmem %s3273_s15, 256  ;;  %s3081_s3 = smov [#allocation5]  }
  0x5a   : > { %p2987_p0 = scmp.ne.s32.totalorder %s3273_s15, %s2986_s22  ;;  %s2991_s4 = sshll.u32 %s3081_s3, 4  ;;  %s2992_s4 = int_to_ptr.vmem [resolvable:$false] %s2991_s4 }
  0x5b   : > { %s2993_s23 = scalar_lea.vmem %s2992_s4, 512  ;;  %p2994_p5 = scmp.lt.s32.totalorder %s3273_s15, %s2992_s4 }
  0x5c   : > { %p2989_p6 = pnand %p2987_p0, %p2975_p3  ;;  %p2995_p9 = scmp.lt.s32.totalorder %s2993_s23, %s2986_s22 }
  0x5e   : > { %p2990_p11 = pneg %p2989_p6  ;;  %p2996_p4 = por %p2995_p9, %p2994_p5 }
  0x60   : > { %p2997_p8 = pnand %p2996_p4, %p2990_p11 }
  0x62   : > { %3000 = shalt.err (!%p2997_p8)
}
  0x63   : > { %s3713_s28 = smov 8   ;;  %s3714_s26 = smov 128  }
  0x64   : > { %2732 = dma.hbm_to_vmem [thread:$0]  (!%p3275_p2), %s3271_s25, 256, %s3273_s15, %s3279_s21, %s3714_s26, %s3714_s26, %s3713_s28  }
  0x65   : > { %p3715_p6 = scmp.ne.s32.totalorder %s3707_s18, 0 }
  0x66   : > { %s3306_s3 = sand.u32 (!%p3715_p6), 1, %s3065_s12   ;;  %p3716_p4 = scmp.ne.s32.totalorder (!%p3715_p6), %s3705_s16, 0 }
  0x67   : > { %337 = sbr.rel (%p3715_p6) target bundleno = 3390 (0xd3e), region = 52  ;;  %s2417_s4 = sshll.u32 (!%p3715_p6), %s3306_s3, 4 }
  0x68   : > { %s340_s24 = scalar_lea.sflag (!%p3715_p6), [#allocation6], %s3306_s3  ;;  %s3312_s27 = scalar_lea.vmem (!%p3715_p6), [#allocation5], %s2417_s4 }
  0x6c   : > { %3044 = dma.done.wait (%p3716_p4), %s340_s24, 256  }
  0x6d   : > { %3046 = vsyncadd (%p3716_p4), %s340_s24, 4294967040  ;;  %p3717_p8 = scmp.eq.s32.totalorder %s3169_s0, 0 }
  0x6f   : > { %3048 = dma.done.wait (%p3717_p8), [#allocation9], 1024   ;;  %p3718_p9 = pmov %p3717_p8 }
  0x70   : > { %p3719_p2 = pmov %p3717_p8 }
  0x71   : > { %3050 = vsyncadd (%p3718_p9), [#allocation9], 4294966272 }
  0x72   : > { %3052 = dma.done.wait (%p3719_p2), [#allocation12], 1024   ;;  %p3720_p3 = pmov %p3719_p2 }
  0x73   : > { %v407_v0 = vld [vmem:[#allocation8 + $0x18] sm:$0xff]  ;;  %v406_v2 = vld [vmem:[#allocation8 + $0x10] sm:$0xff]  ;;  %v405_v4 = vld [vmem:[#allocation8 + $0x8] sm:$0xff]  ;;  %vm408_vm0 = vcmask 261120   ;;  %vm675_vm1 = vcmask 64512   ;;  %s3082_s16 = smov 120   ;;  %v648_v24 = vlaneseq }
  0x74   : > { %3054 = vsyncadd (%p3720_p3), [#allocation12], 4294966272  ;;  %v493_v1 = vld [vmem:[#allocation10 + $0x18] sm:$0xff]  ;;  %2552 = vmatprep.subr.mxu0 %v407_v0  ;;  %v492_v3 = vld [vmem:[#allocation10 + $0x10] sm:$0xff]  ;;  %p395_p10 = scmp.lt.s32.totalorder %s3169_s0, 1  ;;  %v3083_v33 = vmov 0.0  }
  0x75   : > { %2563 = vmatprep.subr.mxu1 %v493_v1  ;;  %2553 = vmatpush3.msra.mxu0 %v407_v0  ;;  %v491_v5 = vld [vmem:[#allocation10 + $0x8] sm:$0xff]  ;;  %v404_v6 = vld [vmem:[#allocation8] sm:$0xff]  ;;  %v572_v10 = vld [vmem:[#allocation11 + $0x18] sm:$0xff]  ;;  %v649_v26 = vshrl.u32 %v648_v24, 7  ;;  %v652_v27 = vand.u32 127, %v648_v24  ;;  %vm854_vm3 = vcmask 130048  }
  0x76   : > { %2564 = vmatpush3.msra.mxu1 %v493_v1  ;;  %2554 = vmatprep.subr.mxu0 %v406_v2  ;;  %v490_v7 = vld [vmem:[#allocation10] sm:$0xff]  ;;  %v403_v9 = vld [vmem:[%s3312_s27 + $0x8] sm:$0xff]  ;;  %v571_v11 = vld [vmem:[#allocation11 + $0x10] sm:$0xff]  ;;  %s396_s18 = scalar_select %p395_p10, %s3169_s0, 1  ;;  %vm2118_vm5 = vcmask 130112   ;;  %vm2149_vm6 = vcmask 195712  }
  0x77   : > { %2565 = vmatprep.subr.mxu1 %v492_v3  ;;  %2555 = vmatpush3.msra.mxu0 %v406_v2  ;;  %v402_v8 = vld [vmem:[%s3312_s27] sm:$0xff]  ;;  %v570_v12 = vld [vmem:[#allocation11 + $0x8] sm:$0xff]  ;;  %v667_v29 = vsub.s32 %v649_v26, %v652_v27  ;;  %v662_v31 = vsub.s32 0, %v649_v26  ;;  %vm653_vm2 = vcmp.gt.s32.totalorder %v652_v27, %v649_v26  ;;  %v650_v43 = vadd.s32 8, %v649_v26  ;;  %s3084_s29 = smov 104   ;;  %s3085_s30 = smov 112  }
  0x78   : > { %2566 = vmatpush3.msra.mxu1 %v492_v3  ;;  %2556 = vmatprep.subr.mxu0 %v405_v4  ;;  %v569_v13 = vld [vmem:[#allocation11] sm:$0xff]  ;;  %s397_s21 = scalar_lea.vmem %s3689_s2, %s396_s18  ;;  %v655_v34 = vsel %vm653_vm2, -1e+09, %v3083_v33  ;;  %s398_s22 = sld [smem:[#allocation4]]  ;;  %vm2180_vm7 = vcmask 261312  }
  0x79   : > { %2567 = vmatprep.subr.mxu1 %v491_v5  ;;  %2557 = vmatpush3.msra.mxu0 %v405_v4  ;;  %v401_v25 = vld [vmem:[%s397_s21] sm:$0x1]  ;;  %v3381_v32 = vcvt.s32.f32 %v667_v29  ;;  %v668_v44 = vsub.s32 %v650_v43, %v652_v27  ;;  %vm654_vm4 = vcmp.gt.s32.totalorder %v652_v27, %v650_v43  ;;  %s3086_s23 = smov 88   ;;  %s3087_s28 = smov 96  }
  0x7a   : > { %2568 = vmatpush3.msra.mxu1 %v491_v5  ;;  %2558 = vmatprep.subr.mxu0 %v404_v6  ;;  %v657_v28 = vsub.f32 1.0, %v401_v25  ;;  %v656_v46 = vsel %vm654_vm4, -1e+09, %v3083_v33  ;;  %s3088_s26 = smov 72   ;;  %s3089_s24 = smov 80  }
  0x7b   : > { %2569 = vmatprep.subr.mxu1 %v490_v7  ;;  %2559 = vmatpush3.msra.mxu0 %v404_v6  ;;  %v671_v37 = vmul.f32 0.25, %v3381_v32  ;;  %v3388_v45 = vcvt.s32.f32 %v668_v44  ;;  %s394_s25 = scalar_lea.vmem [#allocation14], %s2417_s4  ;;  %s2479_s21 = sshll.u32 %s3169_s0, 8 }
  0x7c   : > { %2560 = vmatprep.mubr.msk.f32.mxu0 %vm408_vm0, %v402_v8  ;;  %2570 = vmatpush3.msra.mxu1 %v490_v7  ;;  %v658_v30 = vmul.f32 -1e+09, %v657_v28  ;;  %s2286_s15 = sshll.u32 %s394_s25, 4  ;;  %p3721_p7 = scmp.ne.s32.totalorder %s3711_s19, 0  ;;  %s3636_s15 = int_to_ptr.vmem [resolvable:$true] %s2286_s15 }
  0x7d   : > { %2571 = vmatprep.mubr.msk.f32.mxu1 %vm408_vm0, %v402_v8  ;;  %2561 = vmatmul.mubr.msk.f32.vlgmr.msra.gmra.mxu0 %vm408_vm0, %v403_v9  ;;  %v672_v48 = vmul.f32 0.25, %v3388_v45  ;;  %s3001_s4 = scalar_lea.vmem %s3636_s15, 256  ;;  %s3093_s0 = smov [#allocation14]  }
  0x7e   : > { %2572 = vmatmul.mubr.msk.f32.vlgmr.msra.gmra.mxu1 %vm408_vm0, %v403_v9  ;;  %2582 = vmatprep.mubr.msk.f32.mxu0 %vm408_vm0, %v402_v8  ;;  %v663_v35 = vrot.slane %v658_v30, %v662_v31  ;;  %v3422_v30 = vstv %s398_s22  ;;  %p3002_p12 = scmp.ne.s32.totalorder %s3636_s15, %s3001_s4 }
  0x7f   : > { %2574 = vmatprep.subr.mxu0 %v572_v10 }
  0x80   : > { %2575 = vmatpush3.msra.mxu0 %v572_v10  ;;  %v3383_v36 = vadd.f32 %v663_v35, %v655_v34  ;;  %v3390_v47 = vadd.f32 %v663_v35, %v656_v46  ;;  %p3003_p1 = pnand %p3002_p12, %p3721_p7 }
  0x81   : > { %2576 = vmatprep.subr.mxu0 %v571_v11 }
  0x82   : > { %2577 = vmatpush3.msra.mxu0 %v571_v11  ;;  %v673_v38 = vsub.f32 %v3383_v36, %v671_v37  ;;  %v674_v49 = vsub.f32 %v3390_v47, %v672_v48  ;;  %p3004_p13 = pneg %p3003_p1 }
  0x83   : > { %2578 = vmatprep.subr.mxu0 %v570_v12 }
  0x84   : > { %2579 = vmatpush3.msra.mxu0 %v570_v12 }
  0x85   : > { %2580 = vmatprep.subr.mxu0 %v569_v13 }
  0x86   : > { %2581 = vmatpush3.msra.mxu0 %v569_v13 }
  0x87   : > { %2583 = vmatmul.mubr.msk.f32.vlgmr.msra.gmra.mxu0 %vm408_vm0, %v403_v9 }
 0x13d   : > { %v3334_v14 = vpop.f32.mrf.mxu0 }
 0x13e   : > { %v3336_v15 = vpop.f32.mrf.mxu1 }
 0x13f   : > { %769 = vrot.lane.b32.xlu0 %v3336_v15, %s3082_s16  ;;  %2585 = vmatprep.subr.msk.mxu1 %vm675_vm1, %v3336_v15  ;;  %v3342_v16 = vpop.f32.mrf.mxu0 }
 0x140   : > { %v3344_v17 = vpop.f32.mrf.mxu1  ;;  %2586 = vmatpush3.xpose.msk.msra.mxu1 %vm675_vm1, %v3336_v15  ;;  %763 = vrot.lane.b32.xlu1 %v3342_v16, %s3082_s16 }
 0x141   : > { %2587 = vmatprep.subr.msk.mxu1 %vm675_vm1, %v3344_v17  ;;  %2589 = vmatprep.mubr.msk.f32.mxu1 %vm675_vm1, %v3342_v16 }
 0x143   : > { %767 = vrot.lane.b32.xlu0 %v3344_v17, %s3082_s16 }
 0x144   : > { %2588 = vmatpush3.xpose.msk.msra.mxu1 %vm675_vm1, %v3344_v17  ;;  %765 = vrot.lane.b32.xlu1 %v3334_v14, %s3082_s16 }
 0x147   : > { %2590 = vmatmul.mubr.msk.f32.vlgmr.msra.gmra.mxu1 %vm675_vm1, %v3334_v14  ;;  %v3362_v18 = vpop.f32.mrf.mxu0 }
 0x148   : > { %2599 = vmatprep.subr.mxu1 %v3362_v18 }
 0x149   : > { %v3365_v19 = vpop.f32.mrf.mxu0  ;;  %2600 = vmatpush3.msra.mxu1 %v3362_v18 }
 0x14a   : > { %2601 = vmatprep.subr.mxu1 %v3365_v19 }
 0x14b   : > { %2602 = vmatpush3.msra.mxu1 %v3365_v19 }
 0x1b1   : > { %v770_v20 = vpop.permute.xlu0 %769 }
 0x1b2   : > { %2592 = vmatprep.subr.msk.mxu0 %vm675_vm1, %v770_v20  ;;  %v764_v21 = vpop.permute.xlu1 %763 }
 0x1b3   : > { %2593 = vmatpush3.xpose.msk.msra.mxu0 %vm675_vm1, %v770_v20  ;;  %2596 = vmatprep.mubr.msk.f32.mxu0 %vm675_vm1, %v764_v21 }
 0x1b5   : > { %v768_v22 = vpop.permute.xlu0 %767 }
 0x1b6   : > { %2594 = vmatprep.subr.msk.mxu0 %vm675_vm1, %v768_v22  ;;  %v766_v23 = vpop.permute.xlu1 %765 }
 0x1b7   : > { %2595 = vmatpush3.xpose.msk.msra.mxu0 %vm675_vm1, %v768_v22 }
 0x1ba   : > { %2597 = vmatmul.mubr.msk.f32.vlgmr.msra.gmra.mxu0 %vm675_vm1, %v766_v23 }
 0x207   : > { %v2591_v39 = vpop.f32.mrf.mxu1 }
 0x208   : > { %v760_v55 = vadd.f32 %v2591_v39, %v674_v49 }
 0x209   : > { %v754_v40 = vpop.f32.mrf.mxu1 }
 0x20a   : > { %v755_v41 = vadd.f32 %v754_v40, %v673_v38  ;;  %v858_v57 = vsel %vm854_vm3, %v760_v55, -inf }
 0x20c   : > { %v855_v42 = vsel %vm854_vm3, %v755_v41, -inf }
 0x20d   : > { %856 = vmax.xlane.f32.xlu0 %v855_v42 }
 0x27a   : > { %v2598_v50 = vpop.f32.mrf.mxu0 }
 0x27b   : > { %v851_v51 = vadd.f32 %v2598_v50, %v674_v49  ;;  %v1014_v49 = vmul.f32 0.0625, %v3388_v45  ;;  %v1013_v50 = vmul.f32 0.0625, %v3381_v32 }
 0x27c   : > { %v845_v52 = vpop.f32.mrf.mxu0 }
 0x27d   : > { %v846_v53 = vadd.f32 %v845_v52, %v673_v38  ;;  %v880_v54 = vsel %vm854_vm3, %v851_v51, -inf  ;;  %v1015_v52 = vsub.f32 %v3383_v36, %v1013_v50 }
 0x27e   : > { %881 = vmax.xlane.f32.xlu1 %v880_v54 }
 0x27f   : > { %v877_v56 = vsel %vm854_vm3, %v846_v53, -inf }
 0x280   : > { %878 = vmax.xlane.f32.xlu0 %v877_v56 }
 0x284   : > { %859 = vmax.xlane.f32.xlu0 %v858_v57 }
 0x28f   : > { %1114 = vrot.lane.b32.xlu1 %v3336_v15, %s3084_s29 }
 0x296   : > { %v857_v58 = vpop.xlane.xlu0 %856 }
 0x297   : > { %v861_v59 = vsub.f32 %v755_v41, %v857_v58 }
 0x299   : > { %v863_v60 = vmul.f32 1.442695, %v861_v59 }
 0x29b   : > { %2797 = vpow2.f32 %v863_v60 }
 0x2a8   : > { %v2798_v61 = vpop.eup %2797 }
 0x2a9   : > { %v867_v62 = vsel %vm854_vm3, %v2798_v61, 0.0 }
 0x2b3   : > { %868 = vadd.xlane.f32.xlu1 %v867_v62 }
 0x2c4   : > { %1112 = vrot.lane.b32.xlu1 %v3344_v17, %s3084_s29 }
 0x2c8   : > { %1021 = vrot.lane.b32.xlu1 %v3344_v17, %s3085_s30 }
 0x307   : > { %v882_v63 = vpop.xlane.xlu1 %881 }
 0x308   : > { %v884_v3 = vsub.f32 %v851_v51, %v882_v63  ;;  %v1016_v51 = vsub.f32 %v3390_v47, %v1014_v49 }
 0x309   : > { %v879_v0 = vpop.xlane.xlu0 %878 }
 0x30a   : > { %v883_v1 = vsub.f32 %v846_v53, %v879_v0  ;;  %v887_v7 = vmul.f32 1.442695, %v884_v3 }
 0x30b   : > { %v1115_v2 = vpop.permute.xlu1 %1114 }
 0x30c   : > { %v885_v4 = vmul.f32 1.442695, %v883_v1  ;;  %2613 = vmatprep.subr.msk.mxu0 %vm675_vm1, %v1115_v2 }
 0x30d   : > { %2614 = vmatpush3.xpose.msk.msra.mxu0 %vm675_vm1, %v1115_v2  ;;  %v860_v5 = vpop.xlane.xlu0 %859 }
 0x30e   : > { %2799 = vpow2.f32 %v885_v4  ;;  %v862_v6 = vsub.f32 %v760_v55, %v860_v5 }
 0x310   : > { %v865_v8 = vmul.f32 1.442695, %v862_v6 }
 0x312   : > { %2801 = vpow2.f32 %v865_v8 }
 0x313   : > { %2803 = vpow2.f32 %v887_v7 }
 0x31b   : > { %v2800_v9 = vpop.eup %2799 }
 0x31c   : > { %v889_v10 = vsel %vm854_vm3, %v2800_v9, 0.0 }
 0x31d   : > { %890 = vadd.xlane.f32.xlu1 %v889_v10 }
 0x31f   : > { %v2802_v11 = vpop.eup %2801 }
 0x320   : > { %v870_v12 = vsel %vm854_vm3, %v2802_v11, 0.0  ;;  %v2804_v13 = vpop.eup %2803 }
 0x321   : > { %871 = vadd.xlane.f32.xlu0 %v870_v12  ;;  %v892_v20 = vsel %vm854_vm3, %v2804_v13, 0.0 }
 0x325   : > { %893 = vadd.xlane.f32.xlu0 %v892_v20 }
 0x32e   : > { %1110 = vrot.lane.b32.xlu1 %v3334_v14, %s3084_s29 }
 0x332   : > { %1019 = vrot.lane.b32.xlu1 %v3334_v14, %s3085_s30 }
 0x33b   : > { %1023 = vrot.lane.b32.xlu0 %v3336_v15, %s3085_s30 }
 0x33c   : > { %v869_v21 = vpop.xlane.xlu1 %868 }
 0x33d   : > { %2805 = vrcp.f32 %v869_v21 }
 0x33f   : > { %1108 = vrot.lane.b32.xlu0 %v3342_v16, %s3084_s29 }
 0x340   : > { %v1113_v22 = vpop.permute.xlu1 %1112 }
 0x341   : > { %2615 = vmatprep.subr.msk.mxu0 %vm675_vm1, %v1113_v22 }
 0x342   : > { %2616 = vmatpush3.xpose.msk.msra.mxu0 %vm675_vm1, %v1113_v22 }
 0x343   : > { %1017 = vrot.lane.b32.xlu0 %v3342_v16, %s3085_s30 }
 0x344   : > { %v1022_v23 = vpop.permute.xlu1 %1021 }
 0x34a   : > { %v2806_v28 = vpop.eup %2805 }
 0x34b   : > { %v875_v35 = vmul.f32 %v2806_v28, %v2798_v61 }
 0x3a6   : > { %v891_v24 = vpop.xlane.xlu1 %890 }
 0x3a7   : > { %2807 = vrcp.f32 %v891_v24 }
 0x3aa   : > { %v872_v25 = vpop.xlane.xlu0 %871  ;;  %v1111_v34 = vpop.permute.xlu1 %1110 }
 0x3ab   : > { %2809 = vrcp.f32 %v872_v25 }
 0x3ae   : > { %v894_v26 = vpop.xlane.xlu0 %893  ;;  %v1020_v48 = vpop.permute.xlu1 %1019 }
 0x3af   : > { %2811 = vrcp.f32 %v894_v26 }
 0x3b2   : > { %v1024_v27 = vpop.permute.xlu0 %1023 }
 0x3b3   : > { %2606 = vmatprep.subr.msk.mxu1 %vm675_vm1, %v1024_v27 }
 0x3b4   : > { %v2808_v29 = vpop.eup %2807 }
 0x3b5   : > { %v897_v31 = vmul.f32 %v2808_v29, %v2800_v9 }
 0x3b6   : > { %v1109_v33 = vpop.permute.xlu0 %1108 }
 0x3b7   : > { %2617 = vmatprep.mubr.msk.f32.mxu0 %vm675_vm1, %v1109_v33  ;;  %v900_v37 = vmul.f32 %v3422_v30, %v897_v31 }
 0x3b8   : > { %2618 = vmatmul.mubr.msk.f32.vlgmr.msra.gmra.mxu0 %vm675_vm1, %v1111_v34  ;;  %v2810_v39 = vpop.eup %2809 }
 0x3b9   : > { %v902_v38 = vsub.f32 %v875_v35, %v900_v37  ;;  %v876_v42 = vmul.f32 %v2810_v39, %v2802_v11 }
 0x3ba   : > { %v1018_v46 = vpop.permute.xlu0 %1017 }
 0x3bb   : > { %2603 = vmatprep.mubr.msk.f32.mxu1 %vm854_vm3, %v902_v38 }
 0x3bc   : > { %v2812_v40 = vpop.eup %2811 }
 0x3bd   : > { %v898_v41 = vmul.f32 %v2812_v40, %v2804_v13 }
 0x3bf   : > { %v901_v43 = vmul.f32 %v3422_v30, %v898_v41 }
 0x3c1   : > { %v903_v44 = vsub.f32 %v876_v42, %v901_v43 }
 0x3c3   : > { %2604 = vmatmul.mubr.msk.f32.vlgmr.msra.gmra.mxu1 %vm854_vm3, %v903_v44 }
 0x3c4   : > { %2607 = vmatpush3.xpose.msk.msra.mxu1 %vm675_vm1, %v1024_v27  ;;  %2610 = vmatprep.mubr.msk.f32.mxu1 %vm675_vm1, %v1018_v46 }
 0x3c5   : > { %2608 = vmatprep.subr.msk.mxu1 %vm675_vm1, %v1022_v23 }
 0x3c8   : > { %2609 = vmatpush3.xpose.msk.msra.mxu1 %vm675_vm1, %v1022_v23 }
 0x3cb   : > { %2611 = vmatmul.mubr.msk.f32.vlgmr.msra.gmra.mxu1 %vm675_vm1, %v1020_v48 }
 0x478   : > { %v2619_v53 = vpop.f32.mrf.mxu0 }
 0x479   : > { %v1196_v54 = vadd.f32 %v2619_v53, %v1016_v51 }
 0x47a   : > { %v1190_v55 = vpop.f32.mrf.mxu0 }
 0x47b   : > { %v1191_v56 = vadd.f32 %v1190_v55, %v1015_v52  ;;  %v1224_v57 = vsel %vm854_vm3, %v1196_v54, -inf }
 0x47c   : > { %1225 = vmax.xlane.f32.xlu1 %v1224_v57 }
 0x47d   : > { %v1221_v58 = vsel %vm854_vm3, %v1191_v56, -inf }
 0x47e   : > { %1222 = vmax.xlane.f32.xlu0 %v1221_v58 }
 0x483   : > { %v3441_v59 = vpop.f32.mrf.mxu1 }
 0x485   : > { %v3443_v60 = vpop.f32.mrf.mxu1 }
 0x48b   : > { %v2612_v61 = vpop.f32.mrf.mxu1 }
 0x48c   : > { %v1105_v0 = vadd.f32 %v2612_v61, %v1016_v51 }
 0x48d   : > { %v1099_v62 = vpop.f32.mrf.mxu1 }
 0x48e   : > { %v1100_v63 = vadd.f32 %v1099_v62, %v1015_v52  ;;  %v1202_v2 = vsel %vm854_vm3, %v1105_v0, -inf  ;;  %v1364_v62 = vmul.f32 0.015625, %v3381_v32 }
 0x490   : > { %v1199_v1 = vsel %vm854_vm3, %v1100_v63, -inf }
 0x491   : > { %1200 = vmax.xlane.f32.xlu0 %v1199_v1 }
 0x495   : > { %1203 = vmax.xlane.f32.xlu0 %v1202_v2 }
 0x505   : > { %v1226_v3 = vpop.xlane.xlu1 %1225 }
 0x506   : > { %v1228_v4 = vsub.f32 %v1196_v54, %v1226_v3 }
 0x507   : > { %v1223_v5 = vpop.xlane.xlu0 %1222 }
 0x508   : > { %v1231_v6 = vmul.f32 1.442695, %v1228_v4  ;;  %v1227_v7 = vsub.f32 %v1191_v56, %v1223_v5  ;;  %v1365_v5 = vmul.f32 0.015625, %v3388_v45 }
 0x50a   : > { %2813 = vpow2.f32 %v1231_v6  ;;  %v1229_v8 = vmul.f32 1.442695, %v1227_v7  ;;  %v1367_v7 = vsub.f32 %v3390_v47, %v1365_v5 }
 0x50c   : > { %2815 = vpow2.f32 %v1229_v8 }
 0x517   : > { %v3447_v9 = vpop.eup %2813 }
 0x518   : > { %v1236_v10 = vsel %vm854_vm3, %v3447_v9, 0.0 }
 0x519   : > { %v2816_v11 = vpop.eup %2815  ;;  %1237 = vadd.xlane.f32.xlu0 %v1236_v10 }
 0x51a   : > { %v1233_v12 = vsel %vm854_vm3, %v2816_v11, 0.0  ;;  %v1201_v13 = vpop.xlane.xlu0 %1200 }
 0x51b   : > { %1234 = vadd.xlane.f32.xlu1 %v1233_v12  ;;  %v1205_v23 = vsub.f32 %v1100_v63, %v1201_v13  ;;  %v1366_v63 = vsub.f32 %v3383_v36, %v1364_v62 }
 0x51d   : > { %v1207_v24 = vmul.f32 1.442695, %v1205_v23 }
 0x51e   : > { %v1204_v20 = vpop.xlane.xlu0 %1203 }
 0x51f   : > { %v1206_v21 = vsub.f32 %v1105_v0, %v1204_v20 }
 0x521   : > { %v1209_v22 = vmul.f32 1.442695, %v1206_v21 }
 0x523   : > { %2817 = vpow2.f32 %v1209_v22 }
 0x524   : > { %2819 = vpow2.f32 %v1207_v24 }
 0x52c   : > { %1251 = vrot.lane.b32.xlu1 %v3362_v18, %s3082_s16 }
 0x52f   : > { %1249 = vrot.lane.b32.xlu0 %v3365_v19, %s3082_s16 }
 0x530   : > { %1465 = vrot.lane.b32.xlu1 %v3336_v15, %s3086_s23  ;;  %v2818_v25 = vpop.eup %2817 }
 0x531   : > { %v1214_v26 = vsel %vm854_vm3, %v2818_v25, 0.0  ;;  %v2820_v27 = vpop.eup %2819 }
 0x532   : > { %v1211_v28 = vsel %vm854_vm3, %v2820_v27, 0.0 }
 0x534   : > { %1374 = vrot.lane.b32.xlu1 %v3336_v15, %s3087_s28 }
 0x538   : > { %1372 = vrot.lane.b32.xlu1 %v3344_v17, %s3087_s28 }
 0x54e   : > { %1215 = vadd.xlane.f32.xlu0 %v1214_v26 }
 0x55c   : > { %1212 = vadd.xlane.f32.xlu1 %v1211_v28 }
 0x564   : > { %1463 = vrot.lane.b32.xlu0 %v3344_v17, %s3086_s23 }
 0x568   : > { %1459 = vrot.lane.b32.xlu0 %v3342_v16, %s3086_s23 }
 0x56c   : > { %1368 = vrot.lane.b32.xlu0 %v3342_v16, %s3087_s28 }
 0x56d   : > { %1461 = vrot.lane.b32.xlu1 %v3334_v14, %s3086_s23 }
 0x571   : > { %1370 = vrot.lane.b32.xlu1 %v3334_v14, %s3087_s28 }
 0x5a2   : > { %v1238_v29 = vpop.xlane.xlu0 %1237 }
 0x5a4   : > { %v1235_v31 = vpop.xlane.xlu1 %1234 }
 0x5a5   : > { %2821 = vrcp.f32 %v1235_v31 }
 0x5a6   : > { %v1250_v34 = vpop.permute.xlu0 %1249  ;;  %2823 = vrcp.f32 %v1238_v29 }
 0x5a8   : > { %v1252_v33 = vpop.permute.xlu1 %1251 }
 0x5a9   : > { %2620 = vmatprep.subr.mxu1 %v1252_v33 }
 0x5aa   : > { %2621 = vmatpush3.msra.mxu1 %v1252_v33 }
 0x5ab   : > { %2622 = vmatprep.subr.mxu1 %v1250_v34 }
 0x5ac   : > { %v1466_v35 = vpop.permute.xlu1 %1465  ;;  %2623 = vmatpush3.msra.mxu1 %v1250_v34 }
 0x5ad   : > { %2634 = vmatprep.subr.msk.mxu1 %vm675_vm1, %v1466_v35 }
 0x5b0   : > { %v1375_v37 = vpop.permute.xlu1 %1374 }
 0x5b1   : > { %2627 = vmatprep.subr.msk.mxu0 %vm675_vm1, %v1375_v37 }
 0x5b2   : > { %2628 = vmatpush3.xpose.msk.msra.mxu0 %vm675_vm1, %v1375_v37  ;;  %v2822_v46 = vpop.eup %2821 }
 0x5b3   : > { %v2824_v49 = vpop.eup %2823  ;;  %v1241_v51 = vmul.f32 %v2822_v46, %v2816_v11 }
 0x5b4   : > { %v1373_v38 = vpop.permute.xlu1 %1372  ;;  %v1242_v52 = vmul.f32 %v2824_v49, %v3447_v9 }
 0x5b5   : > { %2629 = vmatprep.subr.msk.mxu0 %vm675_vm1, %v1373_v38  ;;  %v1243_v56 = vmul.f32 %v1241_v51, %v3422_v30 }
 0x5b6   : > { %2630 = vmatpush3.xpose.msk.msra.mxu0 %vm675_vm1, %v1373_v38  ;;  %v1244_v57 = vmul.f32 %v1242_v52, %v3422_v30 }
 0x5d7   : > { %v1216_v39 = vpop.xlane.xlu0 %1215 }
 0x5d8   : > { %2825 = vrcp.f32 %v1216_v39 }
 0x5db   : > { %v1464_v40 = vpop.permute.xlu0 %1463 }
 0x5df   : > { %v1460_v41 = vpop.permute.xlu0 %1459 }
 0x5e3   : > { %v1369_v42 = vpop.permute.xlu0 %1368 }
 0x5e4   : > { %2631 = vmatprep.mubr.msk.f32.mxu0 %vm675_vm1, %v1369_v42 }
 0x5e5   : > { %v1213_v43 = vpop.xlane.xlu1 %1212  ;;  %v2826_v50 = vpop.eup %2825 }
 0x5e6   : > { %2827 = vrcp.f32 %v1213_v43  ;;  %v1220_v54 = vmul.f32 %v2826_v50, %v2818_v25 }
 0x5e8   : > { %v1246_v61 = vsub.f32 %v1220_v54, %v1244_v57 }
 0x5e9   : > { %v1462_v44 = vpop.permute.xlu1 %1461 }
 0x5ed   : > { %v1371_v48 = vpop.permute.xlu1 %1370 }
 0x5ee   : > { %2632 = vmatmul.mubr.msk.f32.vlgmr.msra.gmra.mxu0 %vm675_vm1, %v1371_v48 }
 0x5f3   : > { %v2828_v53 = vpop.eup %2827 }
 0x5f4   : > { %v1219_v55 = vmul.f32 %v2828_v53, %v2820_v27 }
 0x5f6   : > { %v1245_v58 = vsub.f32 %v1219_v55, %v1243_v56 }
 0x5f8   : > { %2624 = vmatprep.mubr.msk.f32.mxu1 %vm854_vm3, %v1245_v58 }
 0x5f9   : > { %2625 = vmatmul.mubr.msk.f32.vlgmr.msra.gmra.mxu1 %vm854_vm3, %v1246_v61 }
 0x5fa   : > { %2635 = vmatpush3.xpose.msk.msra.mxu1 %vm675_vm1, %v1466_v35  ;;  %2638 = vmatprep.mubr.msk.f32.mxu1 %vm675_vm1, %v1460_v41 }
 0x5fb   : > { %2636 = vmatprep.subr.msk.mxu1 %vm675_vm1, %v1464_v40 }
 0x5fe   : > { %2637 = vmatpush3.xpose.msk.msra.mxu1 %vm675_vm1, %v1464_v40 }
 0x601   : > { %2639 = vmatmul.mubr.msk.f32.vlgmr.msra.gmra.mxu1 %vm675_vm1, %v1462_v44 }
 0x6ae   : > { %v2633_v0 = vpop.f32.mrf.mxu0 }
 0x6af   : > { %v1456_v13 = vadd.f32 %v2633_v0, %v1367_v7 }
 0x6b0   : > { %v1450_v1 = vpop.f32.mrf.mxu0 }
 0x6b1   : > { %v1451_v2 = vadd.f32 %v1450_v1, %v1366_v63  ;;  %v1553_v21 = vsel %vm854_vm3, %v1456_v13, -inf }
 0x6b3   : > { %v1550_v3 = vsel %vm854_vm3, %v1451_v2, -inf }
 0x6b4   : > { %1551 = vmax.xlane.f32.xlu0 %v1550_v3 }
 0x6b9   : > { %v3486_v4 = vpop.f32.mrf.mxu1 }
 0x6bb   : > { %v3489_v6 = vpop.f32.mrf.mxu1 }
 0x6c1   : > { %v2640_v8 = vpop.f32.mrf.mxu1 }
 0x6c2   : > { %v1547_v9 = vadd.f32 %v2640_v8, %v1367_v7 }
 0x6c3   : > { %v1541_v10 = vpop.f32.mrf.mxu1 }
 0x6c4   : > { %v1542_v11 = vadd.f32 %v1541_v10, %v1366_v63  ;;  %v1575_v12 = vsel %vm854_vm3, %v1547_v9, -inf  ;;  %v1713_v10 = vmul.f32 0.00390625, %v3381_v32 }
 0x6c5   : > { %1576 = vmax.xlane.f32.xlu1 %v1575_v12 }
 0x6c6   : > { %v1572_v20 = vsel %vm854_vm3, %v1542_v11, -inf  ;;  %v1715_v12 = vsub.f32 %v3383_v36, %v1713_v10 }
 0x6c7   : > { %1573 = vmax.xlane.f32.xlu0 %v1572_v20 }
 0x6cb   : > { %1554 = vmax.xlane.f32.xlu0 %v1553_v21 }
 0x73d   : > { %v1552_v22 = vpop.xlane.xlu0 %1551 }
 0x73e   : > { %v1556_v23 = vsub.f32 %v1451_v2, %v1552_v22 }
 0x740   : > { %v1558_v24 = vmul.f32 1.442695, %v1556_v23 }
 0x742   : > { %2829 = vpow2.f32 %v1558_v24 }
 0x74e   : > { %v1577_v38 = vpop.xlane.xlu1 %1576 }
 0x74f   : > { %v2830_v25 = vpop.eup %2829  ;;  %v1579_v39 = vsub.f32 %v1547_v9, %v1577_v38  ;;  %v1714_v9 = vmul.f32 0.00390625, %v3388_v45 }
 0x750   : > { %v1574_v26 = vpop.xlane.xlu0 %1573  ;;  %v1562_v27 = vsel %vm854_vm3, %v2830_v25, 0.0 }
 0x751   : > { %1563 = vadd.xlane.f32.xlu1 %v1562_v27  ;;  %v1578_v35 = vsub.f32 %v1542_v11, %v1574_v26  ;;  %v1582_v40 = vmul.f32 1.442695, %v1579_v39  ;;  %v1716_v11 = vsub.f32 %v3390_v47, %v1714_v9 }
 0x753   : > { %v1580_v37 = vmul.f32 1.442695, %v1578_v35 }
 0x754   : > { %v1555_v28 = vpop.xlane.xlu0 %1554 }
 0x755   : > { %v1557_v29 = vsub.f32 %v1456_v13, %v1555_v28 }
 0x757   : > { %v1560_v31 = vmul.f32 1.442695, %v1557_v29 }
 0x759   : > { %2831 = vpow2.f32 %v1560_v31 }
 0x75a   : > { %2833 = vpow2.f32 %v1580_v37 }
 0x75b   : > { %2835 = vpow2.f32 %v1582_v40 }
 0x762   : > { %1600 = vrot.lane.b32.xlu1 %v3362_v18, %s3085_s30 }
 0x766   : > { %v3498_v33 = vpop.eup %2831  ;;  %1814 = vrot.lane.b32.xlu1 %v3336_v15, %s3088_s26 }
 0x767   : > { %v1565_v34 = vsel %vm854_vm3, %v3498_v33, 0.0  ;;  %v2834_v41 = vpop.eup %2833 }
 0x768   : > { %1566 = vadd.xlane.f32.xlu0 %v1565_v34  ;;  %v1584_v42 = vsel %vm854_vm3, %v2834_v41, 0.0  ;;  %v2836_v43 = vpop.eup %2835 }
 0x769   : > { %v1587_v44 = vsel %vm854_vm3, %v2836_v43, 0.0 }
 0x76a   : > { %1723 = vrot.lane.b32.xlu1 %v3336_v15, %s3089_s24 }
 0x76e   : > { %1721 = vrot.lane.b32.xlu1 %v3344_v17, %s3089_s24 }
 0x77e   : > { %1598 = vrot.lane.b32.xlu0 %v3365_v19, %s3085_s30 }
 0x792   : > { %1585 = vadd.xlane.f32.xlu1 %v1584_v42 }
 0x79d   : > { %1588 = vadd.xlane.f32.xlu0 %v1587_v44 }
 0x7a3   : > { %1810 = vrot.lane.b32.xlu1 %v3334_v14, %s3088_s26 }
 0x7a7   : > { %1719 = vrot.lane.b32.xlu1 %v3334_v14, %s3089_s24 }
 0x7b3   : > { %1812 = vrot.lane.b32.xlu0 %v3344_v17, %s3088_s26 }
 0x7b7   : > { %1808 = vrot.lane.b32.xlu0 %v3342_v16, %s3088_s26 }
 0x7bb   : > { %1717 = vrot.lane.b32.xlu0 %v3342_v16, %s3089_s24 }
 0x7da   : > { %v1564_v15 = vpop.xlane.xlu1 %1563 }
 0x7db   : > { %2837 = vrcp.f32 %v1564_v15 }
 0x7de   : > { %v1601_v46 = vpop.permute.xlu1 %1600 }
 0x7df   : > { %2641 = vmatprep.subr.mxu1 %v1601_v46 }
 0x7e0   : > { %2642 = vmatpush3.msra.mxu1 %v1601_v46 }
 0x7e2   : > { %v1815_v48 = vpop.permute.xlu1 %1814 }
 0x7e3   : > { %2655 = vmatprep.subr.msk.mxu0 %vm675_vm1, %v1815_v48 }
 0x7e4   : > { %2656 = vmatpush3.xpose.msk.msra.mxu0 %vm675_vm1, %v1815_v48 }
 0x7e6   : > { %v1724_v51 = vpop.permute.xlu1 %1723 }
 0x7e8   : > { %v2838_v52 = vpop.eup %2837 }
 0x7e9   : > { %v1570_v56 = vmul.f32 %v2838_v52, %v2830_v25  ;;  %v999_v52 = vmul.f32 %v3441_v59, %v3441_v59 }
 0x7ea   : > { %v1722_v14 = vpop.permute.xlu1 %1721 }
 0x7f1   : > { %v1567_v49 = vpop.xlane.xlu0 %1566 }
 0x7f5   : > { %v1599_v50 = vpop.permute.xlu0 %1598 }
 0x7f6   : > { %2643 = vmatprep.subr.mxu1 %v1599_v50 }
 0x7f7   : > { %2644 = vmatpush3.msra.mxu1 %v1599_v50 }
 0x7f8   : > { %2648 = vmatprep.subr.msk.mxu1 %vm675_vm1, %v1724_v51 }
 0x81b   : > { %v1586_v17 = vpop.xlane.xlu1 %1585 }
 0x81c   : > { %2839 = vrcp.f32 %v1586_v17  ;;  %v998_v17 = vmul.f32 %v3443_v60, %v3443_v60 }
 0x81d   : > { %2841 = vrcp.f32 %v1567_v49 }
 0x81f   : > { %v1811_v62 = vpop.permute.xlu1 %1810 }
 0x823   : > { %v1720_v8 = vpop.permute.xlu1 %1719 }
 0x826   : > { %v1589_v16 = vpop.xlane.xlu0 %1588 }
 0x827   : > { %2843 = vrcp.f32 %v1589_v16  ;;  %v985_v16 = vsel %vm675_vm1, %v3443_v60, 0.0 }
 0x829   : > { %v2840_v53 = vpop.eup %2839 }
 0x82a   : > { %v1813_v54 = vpop.permute.xlu0 %1812  ;;  %v1592_v55 = vmul.f32 %v2840_v53, %v2834_v41  ;;  %v2842_v63 = vpop.eup %2841  ;;  %v986_v53 = vsel %vm675_vm1, %v3441_v59, 0.0 }
 0x82b   : > { %2657 = vmatprep.subr.msk.mxu0 %vm675_vm1, %v1813_v54  ;;  %v1571_v2 = vmul.f32 %v2842_v63, %v3498_v33 }
 0x82c   : > { %2658 = vmatpush3.xpose.msk.msra.mxu0 %vm675_vm1, %v1813_v54  ;;  %v1594_v57 = vmul.f32 %v1592_v55, %v3422_v30  ;;  %v987_v54 = vadd.f32 %v986_v53, %v985_v16  ;;  %v1349_v55 = vmul.f32 %v3489_v6, %v3489_v6 }
 0x82e   : > { %v1809_v58 = vpop.permute.xlu0 %1808  ;;  %v1596_v61 = vsub.f32 %v1570_v56, %v1594_v57  ;;  %v1350_v56 = vmul.f32 %v3486_v4, %v3486_v4  ;;  %v1001_v57 = vsel %vm675_vm1, %v999_v52, 0.0 }
 0x82f   : > { %2659 = vmatprep.mubr.msk.f32.mxu0 %vm675_vm1, %v1809_v58  ;;  %v1337_v58 = vsel %vm675_vm1, %v3486_v4, 0.0 }
 0x830   : > { %2660 = vmatmul.mubr.msk.f32.vlgmr.msra.gmra.mxu0 %vm675_vm1, %v1811_v62  ;;  %2645 = vmatprep.mubr.msk.f32.mxu1 %vm854_vm3, %v1596_v61 }
 0x832   : > { %v1718_v7 = vpop.permute.xlu0 %1717 }
 0x834   : > { %v2844_v0 = vpop.eup %2843 }
 0x835   : > { %v1593_v1 = vmul.f32 %v2844_v0, %v2836_v43  ;;  %v1351_v0 = vsel %vm675_vm1, %v1349_v55, 0.0 }
 0x837   : > { %v1595_v3 = vmul.f32 %v1593_v1, %v3422_v30 }
 0x839   : > { %v1597_v5 = vsub.f32 %v1571_v2, %v1595_v3  ;;  %v1352_v3 = vsel %vm675_vm1, %v1350_v56, 0.0 }
 0x83b   : > { %2646 = vmatmul.mubr.msk.f32.vlgmr.msra.gmra.mxu1 %vm854_vm3, %v1597_v5 }
 0x83c   : > { %2649 = vmatpush3.xpose.msk.msra.mxu1 %vm675_vm1, %v1724_v51  ;;  %2652 = vmatprep.mubr.msk.f32.mxu1 %vm675_vm1, %v1718_v7  ;;  %v1353_v7 = vadd.f32 %v1352_v3, %v1351_v0 }
 0x83d   : > { %2650 = vmatprep.subr.msk.mxu1 %vm675_vm1, %v1722_v14 }
 0x840   : > { %2651 = vmatpush3.xpose.msk.msra.mxu1 %vm675_vm1, %v1722_v14 }
 0x843   : > { %2653 = vmatmul.mubr.msk.f32.vlgmr.msra.gmra.mxu1 %vm675_vm1, %v1720_v8 }
 0x8f0   : > { %v2661_v13 = vpop.f32.mrf.mxu0 }
 0x8f1   : > { %v1896_v20 = vadd.f32 %v2661_v13, %v1716_v11 }
 0x8f2   : > { %v1890_v21 = vpop.f32.mrf.mxu0 }
 0x8f3   : > { %v1891_v22 = vadd.f32 %v1890_v21, %v1715_v12  ;;  %v1924_v23 = vsel %vm854_vm3, %v1896_v20, -inf }
 0x8f4   : > { %1925 = vmax.xlane.f32.xlu1 %v1924_v23 }
 0x8f5   : > { %v1921_v24 = vsel %vm854_vm3, %v1891_v22, -inf }
 0x8f6   : > { %1922 = vmax.xlane.f32.xlu0 %v1921_v24 }
 0x8fb   : > { %v3537_v25 = vpop.f32.mrf.mxu1 }
 0x8fc   : > { %v1699_v2 = vmul.f32 %v3537_v25, %v3537_v25  ;;  %v1686_v5 = vsel %vm675_vm1, %v3537_v25, 0.0 }
 0x8fd   : > { %v3539_v26 = vpop.f32.mrf.mxu1 }
 0x8fe   : > { %v1698_v63 = vmul.f32 %v3539_v26, %v3539_v26  ;;  %v1685_v1 = vsel %vm675_vm1, %v3539_v26, 0.0  ;;  %v1701_v10 = vsel %vm675_vm1, %v1699_v2, 0.0 }
 0x8ff   : > { %v1687_v8 = vadd.f32 %v1686_v5, %v1685_v1 }
 0x900   : > { %v1700_v9 = vsel %vm675_vm1, %v1698_v63, 0.0 }
 0x903   : > { %v2654_v45 = vpop.f32.mrf.mxu1 }
 0x904   : > { %v1805_v47 = vadd.f32 %v2654_v45, %v1716_v11  ;;  %v1702_v11 = vadd.f32 %v1701_v10, %v1700_v9 }
 0x905   : > { %v1799_v32 = vpop.f32.mrf.mxu1 }
 0x906   : > { %v1800_v27 = vadd.f32 %v1799_v32, %v1715_v12  ;;  %v1902_v28 = vsel %vm854_vm3, %v1805_v47, -inf }
 0x908   : > { %v1899_v36 = vsel %vm854_vm3, %v1800_v27, -inf }
 0x909   : > { %1900 = vmax.xlane.f32.xlu0 %v1899_v36 }
 0x90d   : > { %1903 = vmax.xlane.f32.xlu0 %v1902_v28 }
 0x97d   : > { %v1926_v29 = vpop.xlane.xlu1 %1925 }
 0x97e   : > { %v1928_v31 = vsub.f32 %v1896_v20, %v1926_v29 }
 0x97f   : > { %v1923_v33 = vpop.xlane.xlu0 %1922 }
 0x980   : > { %v1931_v34 = vmul.f32 1.442695, %v1928_v31  ;;  %v1927_v35 = vsub.f32 %v1891_v22, %v1923_v33 }
 0x982   : > { %2845 = vpow2.f32 %v1931_v34  ;;  %v1929_v37 = vmul.f32 1.442695, %v1927_v35 }
 0x984   : > { %2847 = vpow2.f32 %v1929_v37 }
 0x98f   : > { %v3543_v38 = vpop.eup %2845 }
 0x990   : > { %v1936_v39 = vsel %vm854_vm3, %v3543_v38, 0.0 }
 0x991   : > { %v3547_v40 = vpop.eup %2847  ;;  %1937 = vadd.xlane.f32.xlu0 %v1936_v39 }
 0x992   : > { %v1901_v41 = vpop.xlane.xlu0 %1900  ;;  %v1933_v42 = vsel %vm854_vm3, %v3547_v40, 0.0 }
 0x993   : > { %v1905_v43 = vsub.f32 %v1800_v27, %v1901_v41  ;;  %1934 = vadd.xlane.f32.xlu1 %v1933_v42 }
 0x995   : > { %v1907_v44 = vmul.f32 1.442695, %v1905_v43 }
 0x996   : > { %v1904_v15 = vpop.xlane.xlu0 %1903 }
 0x997   : > { %2849 = vpow2.f32 %v1907_v44  ;;  %v1906_v46 = vsub.f32 %v1805_v47, %v1904_v15 }
 0x999   : > { %v1909_v48 = vmul.f32 1.442695, %v1906_v46 }
 0x99b   : > { %2851 = vpow2.f32 %v1909_v48 }
 0x9a4   : > { %v2850_v49 = vpop.eup %2849 }
 0x9a5   : > { %v1911_v50 = vsel %vm854_vm3, %v2850_v49, 0.0 }
 0x9a6   : > { %1912 = vadd.xlane.f32.xlu1 %v1911_v50 }
 0x9a8   : > { %v2852_v51 = vpop.eup %2851 }
 0x9a9   : > { %v1914_v14 = vsel %vm854_vm3, %v2852_v51, 0.0 }
 0x9aa   : > { %1915 = vadd.xlane.f32.xlu0 %v1914_v14 }
 0x9b7   : > { %1949 = vrot.lane.b32.xlu1 %v3362_v18, %s3084_s29  ;;  %v1000_v18 = vsel %vm675_vm1, %v998_v17, 0.0 }
 0x9b8   : > { %v1002_v61 = vadd.f32 %v1001_v57, %v1000_v18 }
 0x9c0   : > { %1947 = vrot.lane.b32.xlu0 %v3365_v19, %s3084_s29  ;;  %v1336_v19 = vsel %vm675_vm1, %v3489_v6, 0.0 }
 0x9c1   : > { %v1338_v62 = vadd.f32 %v1337_v58, %v1336_v19 }
 0x9db   : > { %988 = vadd.xlane.f32.xlu1 %v987_v54 }
 0x9df   : > { %1003 = vadd.xlane.f32.xlu0 %v1002_v61  ;;  %1339 = vadd.xlane.f32.xlu1 %v1338_v62 }
 0x9e3   : > { %1354 = vadd.xlane.f32.xlu0 %v1353_v7  ;;  %1688 = vadd.xlane.f32.xlu1 %v1687_v8 }
 0x9e7   : > { %1703 = vadd.xlane.f32.xlu0 %v1702_v11 }
 0xa1a   : > { %v1938_v13 = vpop.xlane.xlu0 %1937 }
 0xa1c   : > { %v1935_v12 = vpop.xlane.xlu1 %1934 }
 0xa1d   : > { %2853 = vrcp.f32 %v1935_v12 }
 0xa1e   : > { %2855 = vrcp.f32 %v1938_v13 }
 0xa2a   : > { %v2854_v23 = vpop.eup %2853 }
 0xa2b   : > { %v1941_v45 = vmul.f32 %v2854_v23, %v3547_v40  ;;  %v2856_v32 = vpop.eup %2855 }
 0xa2c   : > { %v1942_v47 = vmul.f32 %v2856_v32, %v3543_v38 }
 0xa2d   : > { %v1943_v28 = vmul.f32 %v1941_v45, %v3422_v30 }
 0xa2e   : > { %v1944_v34 = vmul.f32 %v1942_v47, %v3422_v30 }
 0xa2f   : > { %v1913_v20 = vpop.xlane.xlu1 %1912 }
 0xa30   : > { %2857 = vrcp.f32 %v1913_v20 }
 0xa33   : > { %v1950_v21 = vpop.permute.xlu1 %1949  ;;  %v1916_v22 = vpop.xlane.xlu0 %1915 }
 0xa34   : > { %2859 = vrcp.f32 %v1916_v22  ;;  %2662 = vmatprep.subr.mxu1 %v1950_v21 }
 0xa35   : > { %2663 = vmatpush3.msra.mxu1 %v1950_v21 }
 0xa37   : > { %v1948_v24 = vpop.permute.xlu0 %1947 }
 0xa38   : > { %2664 = vmatprep.subr.mxu1 %v1948_v24 }
 0xa39   : > { %2665 = vmatpush3.msra.mxu1 %v1948_v24 }
 0xa3d   : > { %v2858_v27 = vpop.eup %2857 }
 0xa3e   : > { %v1919_v36 = vmul.f32 %v2858_v27, %v2850_v49 }
 0xa40   : > { %v1945_v29 = vsub.f32 %v1919_v36, %v1943_v28  ;;  %v2469_v28 = vld [vmem:[%s3694_s7] ss:$0 sm:$0xff] }
 0xa41   : > { %v2860_v31 = vpop.eup %2859 }
 0xa42   : > { %2666 = vmatprep.mubr.msk.f32.mxu1 %vm854_vm3, %v1945_v29  ;;  %v1920_v33 = vmul.f32 %v2860_v31, %v2852_v51 }
 0xa44   : > { %v1946_v35 = vsub.f32 %v1920_v33, %v1944_v34  ;;  %v2470_v33 = vld [vmem:[%s3695_s8] ss:$0 sm:$0xff] }
 0xa46   : > { %2667 = vmatmul.mubr.msk.f32.vlgmr.msra.gmra.mxu1 %vm854_vm3, %v1946_v35 }
 0xa64   : > { %v989_v37 = vpop.xlane.xlu1 %988 }
 0xa65   : > { %v990_v39 = vrot.slane %v989_v37, 4 }
 0xa67   : > { %v991_v40 = vadd.f32 %v990_v39, %v989_v37 }
 0xa68   : > { %v1004_v41 = vpop.xlane.xlu0 %1003  ;;  %v1340_v42 = vpop.xlane.xlu1 %1339 }
 0xa69   : > { %v992_v43 = vrot.slane %v991_v40, 2  ;;  %v1005_v38 = vrot.slane %v1004_v41, 4  ;;  %v1341_v44 = vrot.slane %v1340_v42, 4 }
 0xa6b   : > { %v1006_v15 = vadd.f32 %v1005_v38, %v1004_v41  ;;  %v1342_v46 = vadd.f32 %v1341_v44, %v1340_v42  ;;  %v993_v48 = vadd.f32 %v992_v43, %v991_v40 }
 0xa6c   : > { %v1355_v49 = vpop.xlane.xlu0 %1354  ;;  %v1689_v50 = vpop.xlane.xlu1 %1688 }
 0xa6d   : > { %v1007_v14 = vrot.slane %v1006_v15, 2  ;;  %v1343_v51 = vrot.slane %v1342_v46, 2  ;;  %v1356_v17 = vrot.slane %v1355_v49, 4  ;;  %v1690_v30 = vrot.slane %v1689_v50, 4 }
 0xa6e   : > { %v994_v16 = vrot.slane %v993_v48, 1 }
 0xa6f   : > { %v1357_v52 = vadd.f32 %v1356_v17, %v1355_v49  ;;  %v1691_v53 = vadd.f32 %v1690_v30, %v1689_v50  ;;  %v1008_v54 = vadd.f32 %v1007_v14, %v1006_v15  ;;  %v1344_v55 = vadd.f32 %v1343_v51, %v1342_v46 }
 0xa70   : > { %v1704_v18 = vpop.xlane.xlu0 %1703  ;;  %v995_v19 = vadd.f32 %v994_v16, %v993_v48 }
 0xa71   : > { %v1358_v56 = vrot.slane %v1357_v52, 2  ;;  %v1692_v57 = vrot.slane %v1691_v53, 2  ;;  %v1705_v58 = vrot.slane %v1704_v18, 4  ;;  %v1009_v61 = vrot.slane %v1008_v54, 1 }
 0xa72   : > { %2680 = vpush %v995_v19  ;;  %v1345_v62 = vrot.slane %v1344_v55, 1 }
 0xa73   : > { %v1706_v63 = vadd.f32 %v1705_v58, %v1704_v18  ;;  %v1010_v0 = vadd.f32 %v1009_v61, %v1008_v54  ;;  %v1359_v1 = vadd.f32 %v1358_v56, %v1357_v52  ;;  %v1693_v2 = vadd.f32 %v1692_v57, %v1691_v53 }
 0xa74   : > { %v1346_v3 = vadd.f32 %v1345_v62, %v1344_v55 }
 0xa75   : > { %v1707_v5 = vrot.slane %v1706_v63, 2  ;;  %2682 = vpush %v1010_v0  ;;  %v1360_v7 = vrot.slane %v1359_v1, 1  ;;  %v1694_v8 = vrot.slane %v1693_v2, 1 }
 0xa76   : > { %2684 = vpush %v1346_v3 }
 0xa77   : > { %v1361_v9 = vadd.f32 %v1360_v7, %v1359_v1  ;;  %v1695_v10 = vadd.f32 %v1694_v8, %v1693_v2  ;;  %v1708_v11 = vadd.f32 %v1707_v5, %v1706_v63 }
 0xa79   : > { %2686 = vpush %v1361_v9  ;;  %v1709_v12 = vrot.slane %v1708_v11, 1 }
 0xa7a   : > { %2688 = vpush %v1695_v10 }
 0xa7b   : > { %v1710_v13 = vadd.f32 %v1709_v12, %v1708_v11 }
 0xa7d   : > { %2690 = vpush %v1710_v13 }
 0xaa3   : > { %s2681_s27 = spop %2680 }
 0xaa4   : > { %v997_v20 = vstv %s2681_s27 }
 0xaa5   : > { %v2062_v21 = vmul.f32 0.0078125, %v997_v20 }
 0xaa6   : > { %s2683_s18 = spop %2682 }
 0xaa7   : > { %v1012_v22 = vstv %s2683_s18  ;;  %v2064_v24 = vmul.f32 %v2062_v21, %v2062_v21  ;;  %v2066_v27 = vsub.f32 %v3443_v60, %v2062_v21  ;;  %v2067_v47 = vsub.f32 %v3441_v59, %v2062_v21  ;;  %s2685_s23 = spop %2684  ;;  %s3092_s18 = smov 24  }
 0xaa8   : > { %v2063_v23 = vmul.f32 0.0078125, %v1012_v22  ;;  %v1348_v48 = vstv %s2685_s23 }
 0xaa9   : > { %v2090_v50 = vmul.f32 0.0078125, %v1348_v48 }
 0xaaa   : > { %v2065_v45 = vsub.f32 %v2063_v23, %v2064_v24  ;;  %s2687_s28 = spop %2686 }
 0xaab   : > { %s2689_s26 = spop %2688  ;;  %v1363_v49 = vstv %s2687_s28  ;;  %v2092_v16 = vmul.f32 %v2090_v50, %v2090_v50  ;;  %v2094_v62 = vsub.f32 %v3489_v6, %v2090_v50  ;;  %v2095_v63 = vsub.f32 %v3486_v4, %v2090_v50  ;;  %s3642_s28 = scalar_lea.hbm %s3696_s9, %s2479_s21 }
 0xaac   : > { %v2068_v32 = vadd.f32 1e-05, %v2065_v45  ;;  %v1697_v14 = vstv %s2689_s26  ;;  %v2091_v51 = vmul.f32 0.0078125, %v1363_v49  ;;  %s2273_s26 = scalar_lea.sflag [#allocation7], %s3306_s3 }
 0xaad   : > { %v2121_v30 = vmul.f32 0.0078125, %v1697_v14 }
 0xaae   : > { %2861 = vrsqrt.f32 %v2068_v32  ;;  %s2691_s24 = spop %2690  ;;  %v2093_v53 = vsub.f32 %v2091_v51, %v2092_v16 }
 0xaaf   : > { %v1712_v17 = vstv %s2691_s24  ;;  %v2123_v54 = vmul.f32 %v2121_v30, %v2121_v30  ;;  %v2125_v10 = vsub.f32 %v3539_v26, %v2121_v30  ;;  %v2126_v11 = vsub.f32 %v3537_v25, %v2121_v30  ;;  %s3005_s24 = sshll.u32 %s3093_s0, 4  ;;  %s3006_s24 = int_to_ptr.vmem [resolvable:$false] %s3005_s24 }
 0xab0   : > { %v2122_v52 = vmul.f32 0.0078125, %v1712_v17  ;;  %v2096_v18 = vadd.f32 1e-05, %v2093_v53  ;;  %p3008_p0 = scmp.lt.s32.totalorder %s3636_s15, %s3006_s24 }
 0xab2   : > { %v2124_v55 = vsub.f32 %v2122_v52, %v2123_v54  ;;  %2863 = vrsqrt.f32 %v2096_v18 }
 0xab4   : > { %v2127_v19 = vadd.f32 1e-05, %v2124_v55 }
 0xab6   : > { %2865 = vrsqrt.f32 %v2127_v19 }
 0xabb   : > { %v2862_v36 = vpop.eup %2861 }
 0xabc   : > { %v2070_v29 = vmul.f32 %v2862_v36, %v2066_v27  ;;  %v2071_v31 = vmul.f32 %v2862_v36, %v2067_v47 }
 0xabe   : > { %v2078_v34 = vmul.f32 %v2469_v28, %v2070_v29  ;;  %v2079_v35 = vmul.f32 %v2469_v28, %v2071_v31 }
 0xabf   : > { %v2864_v58 = vpop.eup %2863 }
 0xac0   : > { %v2086_v37 = vadd.f32 %v2470_v33, %v2078_v34  ;;  %v2087_v39 = vadd.f32 %v2470_v33, %v2079_v35  ;;  %v2098_v8 = vmul.f32 %v2864_v58, %v2094_v62  ;;  %v2099_v9 = vmul.f32 %v2864_v58, %v2095_v63 }
 0xac2   : > { %2088 = vst.msk [vmem:[#allocation2] sm:$0xff] %vm675_vm1, %v2086_v37  ;;  %2089 = vst.msk [vmem:[#allocation2 + $0x8] sm:$0xff] %vm675_vm1, %v2087_v39 }
 0xac3   : > { %v2866_v3 = vpop.eup %2865 }
 0xac4   : > { %v2129_v6 = vmul.f32 %v2866_v3, %v2125_v10  ;;  %v2130_v23 = vmul.f32 %v2866_v3, %v2126_v11 }
 0xb06   : > { %v3603_v59 = vpop.f32.mrf.mxu1 }
 0xb07   : > { %v2048_v60 = vmul.f32 %v3603_v59, %v3603_v59  ;;  %v2035_v43 = vsel %vm675_vm1, %v3603_v59, 0.0 }
 0xb08   : > { %v3607_v40 = vpop.f32.mrf.mxu1 }
 0xb09   : > { %v2034_v41 = vsel %vm675_vm1, %v3607_v40, 0.0  ;;  %v2047_v42 = vmul.f32 %v3607_v40, %v3607_v40  ;;  %v2050_v15 = vsel %vm675_vm1, %v2048_v60, 0.0 }
 0xb0a   : > { %v2036_v38 = vadd.f32 %v2035_v43, %v2034_v41  ;;  %v2188_v43 = vld [vmem:[#allocation13 + $0x18] sm:$0xff] }
 0xb0b   : > { %v2049_v44 = vsel %vm675_vm1, %v2047_v42, 0.0  ;;  %2669 = vmatprep.subr.mxu0 %v2188_v43 }
 0xb0c   : > { %2037 = vadd.xlane.f32.xlu1 %v2036_v38  ;;  %v2051_v46 = vadd.f32 %v2050_v15, %v2049_v44  ;;  %v2187_v38 = vld [vmem:[#allocation13 + $0x10] sm:$0xff]  ;;  %2670 = vmatpush3.msra.mxu0 %v2188_v43  ;;  %v2186_v15 = vld [vmem:[#allocation13 + $0x8] sm:$0xff] }
 0xb0d   : > { %2671 = vmatprep.subr.mxu0 %v2187_v38 }
 0xb0e   : > { %2052 = vadd.xlane.f32.xlu0 %v2051_v46  ;;  %2672 = vmatpush3.msra.mxu0 %v2187_v38  ;;  %v2185_v46 = vld [vmem:[#allocation13] sm:$0xff] }
 0xb0f   : > { %2673 = vmatprep.subr.mxu0 %v2186_v15 }
 0xb10   : > { %2674 = vmatpush3.msra.mxu0 %v2186_v15 }
 0xb11   : > { %2675 = vmatprep.subr.mxu0 %v2185_v46 }
 0xb12   : > { %2676 = vmatpush3.msra.mxu0 %v2185_v46 }
 0xb1d   : > { %2100 = vrot.lane.b32.xlu1 %v2469_v28, %s3082_s16 }
 0xb21   : > { %2105 = vrot.lane.b32.xlu1 %v2470_v33, %s3082_s16  ;;  %s3090_s16 = smov 8  }
 0xb24   : > { %2131 = vrot.lane.b32.xlu0 %v2469_v28, %s3085_s30 }
 0xb25   : > { %2162 = vrot.lane.b32.xlu1 %v2469_v28, %s3084_s29 }
 0xb28   : > { %2136 = vrot.lane.b32.xlu0 %v2470_v33, %s3085_s30 }
 0xb29   : > { %2167 = vrot.lane.b32.xlu1 %v2470_v33, %s3084_s29  ;;  %s3091_s29 = smov 16  }
 0xb95   : > { %v2038_v56 = vpop.xlane.xlu1 %2037 }
 0xb96   : > { %v2039_v57 = vrot.slane %v2038_v56, 4 }
 0xb97   : > { %v2053_v61 = vpop.xlane.xlu0 %2052 }
 0xb98   : > { %v2040_v0 = vadd.f32 %v2039_v57, %v2038_v56  ;;  %v2054_v1 = vrot.slane %v2053_v61, 4 }
 0xb99   : > { %v2101_v2 = vpop.permute.xlu1 %2100 }
 0xb9a   : > { %v2041_v5 = vrot.slane %v2040_v0, 2  ;;  %v2055_v7 = vadd.f32 %v2054_v1, %v2053_v61  ;;  %v2103_v20 = vmul.f32 %v2101_v2, %v2098_v8  ;;  %v2104_v21 = vmul.f32 %v2101_v2, %v2099_v9 }
 0xb9b   : > { %v2132_v12 = vpop.permute.xlu0 %2131 }
 0xb9c   : > { %v2056_v13 = vrot.slane %v2055_v7, 2  ;;  %v2042_v22 = vadd.f32 %v2041_v5, %v2040_v0  ;;  %v2134_v36 = vmul.f32 %v2132_v12, %v2129_v6  ;;  %v2135_v28 = vmul.f32 %v2132_v12, %v2130_v23 }
 0xb9d   : > { %v2106_v4 = vpop.permute.xlu1 %2105 }
 0xb9e   : > { %v2108_v24 = vadd.f32 %v2106_v4, %v2103_v20  ;;  %v2109_v45 = vadd.f32 %v2106_v4, %v2104_v21  ;;  %v2043_v32 = vrot.slane %v2042_v22, 1  ;;  %v2057_v27 = vadd.f32 %v2056_v13, %v2055_v7 }
 0xb9f   : > { %v2137_v47 = vpop.permute.xlu0 %2136 }
 0xba0   : > { %2114 = vrot.lane.b32.xlu1 %v2109_v45, %s3090_s16  ;;  %2112 = vrot.lane.b32.xlu0 %v2108_v24, %s3090_s16  ;;  %v2044_v25 = vadd.f32 %v2043_v32, %v2042_v22  ;;  %v2058_v26 = vrot.slane %v2057_v27, 1  ;;  %v2139_v29 = vadd.f32 %v2137_v47, %v2134_v36  ;;  %v2140_v31 = vadd.f32 %v2137_v47, %v2135_v28 }
 0xba1   : > { %v2163_v44 = vpop.permute.xlu1 %2162 }
 0xba2   : > { %2692 = vpush %v2044_v25  ;;  %v2059_v33 = vadd.f32 %v2058_v26, %v2057_v27 }
 0xba4   : > { %2694 = vpush %v2059_v33  ;;  %2145 = vrot.lane.b32.xlu1 %v2140_v31, %s3091_s29  ;;  %2143 = vrot.lane.b32.xlu0 %v2139_v29, %s3091_s29  ;;  %s3007_s29 = scalar_lea.vmem %s3006_s24, 512 }
 0xba5   : > { %v2168_v17 = vpop.permute.xlu1 %2167  ;;  %p3009_p11 = scmp.lt.s32.totalorder %s3007_s29, %s3001_s4 }
 0xba7   : > { %p3010_p5 = por %p3009_p11, %p3008_p0 }
 0xba9   : > { %p3011_p6 = pnand %p3010_p5, %p3004_p13 }
 0xbd3   : > { %s2693_s30 = spop %2692 }
 0xbd4   : > { %v2046_v34 = vstv %s2693_s30 }
 0xbd5   : > { %v2152_v35 = vmul.f32 0.0078125, %v2046_v34  ;;  %s2695_s27 = spop %2694 }
 0xbd6   : > { %v2061_v37 = vstv %s2695_s27 }
 0xbd7   : > { %v2153_v39 = vmul.f32 0.0078125, %v2061_v37  ;;  %v2154_v60 = vmul.f32 %v2152_v35, %v2152_v35  ;;  %v2156_v48 = vsub.f32 %v3607_v40, %v2152_v35  ;;  %v2157_v49 = vsub.f32 %v3603_v59, %v2152_v35 }
 0xbd9   : > { %v2155_v41 = vsub.f32 %v2153_v39, %v2154_v60 }
 0xbdb   : > { %v2158_v42 = vadd.f32 1e-05, %v2155_v41 }
 0xbdd   : > { %2867 = vrsqrt.f32 %v2158_v42 }
 0xbea   : > { %v2868_v50 = vpop.eup %2867 }
 0xbeb   : > { %v2160_v14 = vmul.f32 %v2868_v50, %v2156_v48  ;;  %v2161_v51 = vmul.f32 %v2868_v50, %v2157_v49 }
 0xbed   : > { %v2165_v30 = vmul.f32 %v2163_v44, %v2160_v14  ;;  %v2166_v16 = vmul.f32 %v2163_v44, %v2161_v51 }
 0xbef   : > { %v2170_v52 = vadd.f32 %v2168_v17, %v2165_v30  ;;  %v2171_v53 = vadd.f32 %v2168_v17, %v2166_v16 }
 0xbf1   : > { %2176 = vrot.lane.b32.xlu1 %v2171_v53, %s3092_s18  ;;  %2174 = vrot.lane.b32.xlu0 %v2170_v52, %s3092_s18 }
 0xc12   : > { %v2113_v54 = vpop.permute.xlu0 %2112  ;;  %v2115_v40 = vpop.permute.xlu1 %2114 }
 0xc13   : > { %2119 = vst.msk [vmem:[#allocation2] sm:$0xff] %vm2118_vm5, %v2113_v54  ;;  %2120 = vst.msk [vmem:[#allocation2 + $0x8] sm:$0xff] %vm2118_vm5, %v2115_v40 }
 0xc16   : > { %v2144_v59 = vpop.permute.xlu0 %2143  ;;  %v2146_v55 = vpop.permute.xlu1 %2145 }
 0xc17   : > { %2150 = vst.msk [vmem:[#allocation2] sm:$0xff] %vm2149_vm6, %v2144_v59  ;;  %2151 = vst.msk [vmem:[#allocation2 + $0x8] sm:$0xff] %vm2149_vm6, %v2146_v55 }
 0xc63   : > { %v2175_v18 = vpop.permute.xlu0 %2174  ;;  %v2177_v19 = vpop.permute.xlu1 %2176 }
 0xc64   : > { %2181 = vst.msk [vmem:[#allocation2] sm:$0xff] %vm2180_vm7, %v2175_v18  ;;  %2182 = vst.msk [vmem:[#allocation2 + $0x8] sm:$0xff] %vm2180_vm7, %v2177_v19 }
 0xc6b   : > { %v2183_v56 = vld [vmem:[#allocation2] sm:$0xff]  ;;  %v2184_v57 = vld [vmem:[#allocation2 + $0x8] sm:$0xff] }
 0xc6c   : > { %2677 = vmatprep.mubr.msk.f32.mxu0 %vm408_vm0, %v2183_v56 }
 0xc6d   : > { %2678 = vmatmul.mubr.msk.f32.vlgmr.msra.gmra.mxu0 %vm408_vm0, %v2184_v57 }
 0xd2d   : > { %v2679_v58 = vpop.f32.mrf.mxu0 }
 0xd2e   : > { %2271 = vst.msk [vmem:[%s394_s25 + $0x8] sm:$0xff] %vm408_vm0, %v2679_v58 }
 0xd2f   : > { %v2261_v61 = vpop.f32.mrf.mxu0 }
 0xd30   : > { %2270 = vst.msk [vmem:[%s394_s25] sm:$0xff] %vm408_vm0, %v2261_v61 }
 0xd31   : > { %3014 = shalt.err (!%p3011_p6)
}
 0xd32   : > { %s3015_s30 = scalar_lea.hbm %s3642_s28, 256  ;;  %s3019_s25 = scalar_lea.hbm %s3696_s9, 512 }
 0xd33   : > { %p3016_p4 = scmp.ne.s32.totalorder %s3642_s28, %s3015_s30  ;;  %p3020_p2 = scmp.lt.s32.totalorder %s3642_s28, %s3696_s9 }
 0xd34   : > { %p3021_p3 = scmp.lt.s32.totalorder %s3019_s25, %s3015_s30 }
 0xd35   : > { %p3017_p8 = pnand %p3016_p4, %p3721_p7 }
 0xd36   : > { %p3022_p10 = por %p3021_p3, %p3020_p2 }
 0xd37   : > { %p3018_p9 = pneg %p3017_p8 }
 0xd39   : > { %p3023_p12 = pnand %p3022_p10, %p3018_p9 }
 0xd3b   : > { %3026 = shalt.err (!%p3023_p12)
}
 0xd3c   : > { %s3094_s23 = smov 128  }
 0xd3d   : > { %2714 = dma.vmem_to_hbm [thread:$0]  (%p3721_p7), %s3636_s15, 256, %s3642_s28, %s2273_s26, %s3094_s23, %s3094_s23, %s3090_s16  }
 0xd3e PF: > { %s2301_s4 = sand.u32 1, %s3061_s11   ;;  %p3722_p1 = scmp.ne.s32.totalorder %s3706_s17, 0 }
 0xd3f   : > { %p3723_p13 = scmp.ge.s32.totalorder %s3073_s14, 2  ;;  %s2302_s0 = scalar_lea.sflag [#allocation7], %s2301_s4 }
 0xd41   : > { %p2734_p0 = pnand %p3723_p13, %p3722_p1 }
 0xd43   : > { %p2735_p11 = pneg %p2734_p0 }
 0xd45   : > { %3056 = dma.done.wait (%p2735_p11), %s2302_s0, 256  }
 0xd46   : > { %3058 = vsyncadd (%p2735_p11), %s2302_s0, 4294967040  ;;  %p25_p5 = scmp.ge.s32.totalorder %s3248_s10, 4   ;;  %s3724_s11 = smov %s3065_s12 }
 0xd47   : > { %s3725_s12 = smov %s3069_s13  ;;  %s3726_s13 = smov %s3264_s20 }
 0xd48   : > { %s3727_s14 = smov %s3248_s10  ;;  %27 = sbr.rel (!%p25_p5) target bundleno = 11 (0xb), region = 116 }
 0xd4d   :  { %2307 = vsyncpa [#allocation6], 1 }
 0xd4e   :  { %2309 = vsyncpa [#allocation6 + $0x1], 1 }
 0xd4f   :  { %2310 = vsyncpa [#allocation9], 1 }
 0xd50   :  { %2311 = vsyncpa [#allocation12], 1 }
 0xd51   :  { %2312 = vsyncpa [#allocation7], 1 }
 0xd52   :  { %2314 = vsyncpa [#allocation7 + $0x1], 1 }

</bundles_post_ra>
